<compile_context>
chip_gen: v5e
topology: v5e:2x2
jax: 0.10.0
libtpu: 0.0.40
codegen_flags: <defaults>
</compile_context>

<pallas_src>
import functools

import jax
import jax.numpy as jnp
from jax.experimental import pallas as pl
from jax.experimental.pallas import tpu as pltpu

LANE = 128                       # lane width / feature-dim padding
VMEM_LIMIT = 48 * 1024 * 1024    # < 64 MiB physical on v7x; fine on v5e/v6e


# ---------------------------------------------------------------------------
# Kernels
# ---------------------------------------------------------------------------
def fused_gcn_pool_kernel(a_ref, x_ref, w1_ref, b1_ref, w2_ref, b2_ref,
                          w3_ref, b3_ref, p_ref, o_ref):
    """All three GCN layers + global_mean_pool in one pass.

    A_hat is read from HBM exactly once; H1/H2/H3 never touch HBM.
    Everything on the MXU is bf16 x bf16 with f32 accumulation."""
    a = a_ref[...]                                                    # bf16

    h = jnp.dot(a, x_ref[...], preferred_element_type=jnp.float32)
    h = jnp.dot(h.astype(jnp.bfloat16), w1_ref[...],
                preferred_element_type=jnp.float32) + b1_ref[...]
    h = jnp.maximum(h, 0.0).astype(jnp.bfloat16)

    h = jnp.dot(a, h, preferred_element_type=jnp.float32)
    h = jnp.dot(h.astype(jnp.bfloat16), w2_ref[...],
                preferred_element_type=jnp.float32) + b2_ref[...]
    h = jnp.maximum(h, 0.0).astype(jnp.bfloat16)

    h = jnp.dot(a, h, preferred_element_type=jnp.float32)
    h = jnp.dot(h.astype(jnp.bfloat16), w3_ref[...],
                preferred_element_type=jnp.float32) + b3_ref[...]     # f32

    # mean pool (tiny f32 matmul, kept f32 for accuracy)
    o_ref[...] = jnp.dot(p_ref[...], h, preferred_element_type=jnp.float32)


def gcn_layer_kernel(a_ref, h_ref, w_ref, b_ref, o_ref, *, apply_relu):
    """One GCN layer, row tile i (full contraction in one dot):
       O[i] = act( (A[i, :] @ H) @ W + b ).
    a_ref: (tile_m, n_pad) bf16 streamed row strip
    h_ref: (n_pad, d_in)   bf16 resident (constant index -> DMA'd once)
    w_ref: (d_in, d_out)   bf16 resident;  b_ref: (1, d_out) f32 resident."""
    ax = jnp.dot(a_ref[...], h_ref[...], preferred_element_type=jnp.float32)
    h = jnp.dot(ax.astype(jnp.bfloat16), w_ref[...],
                preferred_element_type=jnp.float32) + b_ref[...]
    if apply_relu:
        h = jnp.maximum(h, 0.0)
    o_ref[...] = h.astype(o_ref.dtype)


def gcn_layer3_pool_kernel(a_ref, h_ref, w_ref, b_ref, p_ref, o_ref):
    """Last GCN layer fused with global_mean_pool, per-tile partial output:
       O[i] = P[:, i_tile] @ ( (A[i, :] @ H) @ W3 + b3 ).
    Per-i partials keep the row-tile axis fully parallel (no shared
    accumulator), so megacore/v7x can split the grid."""
    ax = jnp.dot(a_ref[...], h_ref[...], preferred_element_type=jnp.float32)
    h3 = jnp.dot(ax.astype(jnp.bfloat16), w_ref[...],
                 preferred_element_type=jnp.float32) + b_ref[...]
    o_ref[0] = jnp.dot(p_ref[...], h3, preferred_element_type=jnp.float32)


# ---------------------------------------------------------------------------
# pallas_call wrappers
# ---------------------------------------------------------------------------
def _fused_forward(a_p, x_p, w1_p, b1_p, w2_p, b2_p, w3_p, b3_p, p_p):
    n_pad = a_p.shape[0]
    g_pad = p_p.shape[0]
    o_pad = w3_p.shape[1]
    d = LANE

    flops = (3 * 2 * n_pad * n_pad * d + 3 * 2 * n_pad * d * d
             + 2 * g_pad * n_pad * o_pad)
    bytes_accessed = (a_p.size * 2 + x_p.size * 2
                      + (w1_p.size + w2_p.size + w3_p.size) * 2
                      + (b1_p.size + b2_p.size + b3_p.size) * 4
                      + p_p.size * 4 + g_pad * o_pad * 4)

    args = (a_p, x_p, w1_p, b1_p, w2_p, b2_p, w3_p, b3_p, p_p)
    in_specs = [pl.BlockSpec(arg.shape, lambda i: (0, 0)) for arg in args]

    return pl.pallas_call(
        fused_gcn_pool_kernel,
        out_shape=jax.ShapeDtypeStruct((g_pad, o_pad), jnp.float32),
        grid_spec=pltpu.PrefetchScalarGridSpec(
            num_scalar_prefetch=0,
            grid=(1,),
            in_specs=in_specs,
            out_specs=pl.BlockSpec((g_pad, o_pad), lambda i: (0, 0)),
        ),
        compiler_params=pltpu.CompilerParams(
            dimension_semantics=("arbitrary",),
            vmem_limit_bytes=VMEM_LIMIT,
        ),
        cost_estimate=pl.CostEstimate(flops=flops, transcendentals=0,
                                      bytes_accessed=bytes_accessed),
    )(*args)


def _gcn_layer(a_p, h_p, w_p, b_p, *, apply_relu, tile_m):
    n_pad = a_p.shape[0]
    d_in = h_p.shape[1]
    d_out = w_p.shape[1]
    n_tiles = n_pad // tile_m

    flops = 2 * n_pad * n_pad * d_in + 2 * n_pad * d_in * d_out
    bytes_accessed = (a_p.size * 2 + h_p.size * 2 + w_p.size * 2
                      + b_p.size * 4 + n_pad * d_out * 2)

    return pl.pallas_call(
        functools.partial(gcn_layer_kernel, apply_relu=apply_relu),
        out_shape=jax.ShapeDtypeStruct((n_pad, d_out), jnp.bfloat16),
        grid_spec=pltpu.PrefetchScalarGridSpec(
            num_scalar_prefetch=0,
            grid=(n_tiles,),
            in_specs=[
                pl.BlockSpec((tile_m, n_pad), lambda i: (i, 0)),   # A strip (bf16)
                pl.BlockSpec((n_pad, d_in), lambda i: (0, 0)),     # H resident (bf16)
                pl.BlockSpec((d_in, d_out), lambda i: (0, 0)),     # W resident (bf16)
                pl.BlockSpec((1, d_out), lambda i: (0, 0)),        # b resident (f32)
            ],
            out_specs=pl.BlockSpec((tile_m, d_out), lambda i: (i, 0)),
        ),
        compiler_params=pltpu.CompilerParams(
            dimension_semantics=("parallel",),
            vmem_limit_bytes=VMEM_LIMIT,
        ),
        cost_estimate=pl.CostEstimate(flops=flops, transcendentals=0,
                                      bytes_accessed=bytes_accessed),
    )(a_p, h_p, w_p, b_p)


def _gcn_layer3_pool(a_p, h_p, w_p, b_p, p_p, *, tile_m):
    n_pad = a_p.shape[0]
    d_in = h_p.shape[1]
    d_out = w_p.shape[1]
    g_pad = p_p.shape[0]
    n_tiles = n_pad // tile_m

    flops = (2 * n_pad * n_pad * d_in + 2 * n_pad * d_in * d_out
             + 2 * g_pad * n_pad * d_out)
    bytes_accessed = (a_p.size * 2 + h_p.size * 2 + w_p.size * 2
                      + b_p.size * 4 + p_p.size * 4
                      + n_tiles * g_pad * d_out * 4)

    partials = pl.pallas_call(
        gcn_layer3_pool_kernel,
        out_shape=jax.ShapeDtypeStruct((n_tiles, g_pad, d_out), jnp.float32),
        grid_spec=pltpu.PrefetchScalarGridSpec(
            num_scalar_prefetch=0,
            grid=(n_tiles,),
            in_specs=[
                pl.BlockSpec((tile_m, n_pad), lambda i: (i, 0)),   # A strip (bf16)
                pl.BlockSpec((n_pad, d_in), lambda i: (0, 0)),     # H2 resident (bf16)
                pl.BlockSpec((d_in, d_out), lambda i: (0, 0)),     # W3 resident (bf16)
                pl.BlockSpec((1, d_out), lambda i: (0, 0)),        # b3 resident (f32)
                pl.BlockSpec((g_pad, tile_m), lambda i: (0, i)),   # P strip (f32)
            ],
            out_specs=pl.BlockSpec((1, g_pad, d_out), lambda i: (i, 0, 0)),
        ),
        compiler_params=pltpu.CompilerParams(
            dimension_semantics=("parallel",),
            vmem_limit_bytes=VMEM_LIMIT,
        ),
        cost_estimate=pl.CostEstimate(flops=flops, transcendentals=0,
                                      bytes_accessed=bytes_accessed),
    )(a_p, h_p, w_p, b_p, p_p)
    # tiny (n_tiles, g_pad, o_pad) reduction of per-tile pool partials
    return jnp.sum(partials, axis=0)


# ---------------------------------------------------------------------------
# Forward pass
# ---------------------------------------------------------------------------
def _round_up(x, m):
    return (x + m - 1) // m * m


def _pad2(a, rows, cols, dtype):
    out = jnp.zeros((rows, cols), dtype)
    return out.at[:a.shape[0], :a.shape[1]].set(a.astype(dtype))


def graph_anomaly_forward(a_hat, x, params, pool, *, tile_m=256, force_tiled=False):
    """params = (w1, b1, w2, b2, w3, b3); pool is the (G, N) mean-pool matrix."""
    w1, b1, w2, b2, w3, b3 = params
    n = a_hat.shape[0]
    f = x.shape[1]
    hid = w1.shape[1]
    out_dim = w3.shape[1]
    g = pool.shape[0]

    f_pad = _round_up(f, LANE)
    h_pad = _round_up(hid, LANE)
    o_pad = _round_up(out_dim, LANE)
    g_pad = _round_up(g, 8)

    tile_m = min(tile_m, _round_up(n, LANE))          # tile_m is a multiple of 128
    n_pad = _round_up(n, tile_m)

    # Lane-dense, zero-padded operands.  A_hat / activations / weights -> bf16
    # (halves HBM traffic, full-rate MXU); biases / pool stay f32; all matmul
    # accumulation is f32.  Padded rows/cols of A_hat and padded columns of P
    # are zero, so padding never leaks into real rows or the pooled means.
    a_p = _pad2(a_hat, n_pad, n_pad, jnp.bfloat16)
    x_p = _pad2(x, n_pad, f_pad, jnp.bfloat16)
    w1_p = _pad2(w1, f_pad, h_pad, jnp.bfloat16)
    w2_p = _pad2(w2, h_pad, h_pad, jnp.bfloat16)
    w3_p = _pad2(w3, h_pad, o_pad, jnp.bfloat16)
    b1_p = _pad2(b1, 1, h_pad, jnp.float32)
    b2_p = _pad2(b2, 1, h_pad, jnp.float32)
    b3_p = _pad2(b3, 1, o_pad, jnp.float32)
    p_p = _pad2(pool, g_pad, n_pad, jnp.float32)

    # Rough VMEM footprint of the fully fused (A streamed once) path.
    fused_bytes = (2 * n_pad * n_pad            # A bf16 resident
                   + 2 * n_pad * f_pad          # X bf16
                   + 3 * 4 * n_pad * LANE       # f32 intermediate activations
                   + 4 * g_pad * n_pad          # pool f32
                   + 8 * LANE * LANE)           # weights / biases (overcount)
    use_fused = (not force_tiled) and (2 * fused_bytes < VMEM_LIMIT)

    if use_fused:
        out = _fused_forward(a_p, x_p, w1_p, b1_p, w2_p, b2_p, w3_p, b3_p, p_p)
    else:
        h1 = _gcn_layer(a_p, x_p, w1_p, b1_p, apply_relu=True, tile_m=tile_m)
        h2 = _gcn_layer(a_p, h1, w2_p, b2_p, apply_relu=True, tile_m=tile_m)
        out = _gcn_layer3_pool(a_p, h2, w3_p, b3_p, p_p, tile_m=tile_m)
    return out[:g, :out_dim]


# ---------------------------------------------------------------------------
# Plain-JAX glue: GCN normalization + pooling matrix (graph preprocessing).
# ---------------------------------------------------------------------------
def build_gcn_adjacency(edge_index, num_nodes):
    """A_hat = D^{-1/2} (A + I) D^{-1/2}, as in torch_geometric GCNConv.
    Note: duplicate edges are deduped here (PyG would count them in the degree)."""
    src, dst = edge_index[0], edge_index[1]
    adj = jnp.zeros((num_nodes, num_nodes), jnp.float32)
    adj = adj.at[dst, src].set(1.0)                    # messages flow src -> dst
    adj = adj + jnp.eye(num_nodes, dtype=jnp.float32)  # self loops
    deg = jnp.sum(adj, axis=1)
    d_inv_sqrt = jnp.where(deg > 0, 1.0 / jnp.sqrt(deg), 0.0)
    return adj * d_inv_sqrt[:, None] * d_inv_sqrt[None, :]


def build_pool_matrix(batch, num_graphs):
    """P[g, n] = 1/|{n : batch[n]==g}| if batch[n]==g else 0 (global_mean_pool)."""
    onehot = (batch[None, :] == jnp.arange(num_graphs)[:, None]).astype(jnp.float32)
    counts = jnp.maximum(jnp.sum(onehot, axis=1, keepdims=True), 1.0)
    return onehot / counts


def init_params(key, num_features, hidden_dim, output_dim):
    k1, k2, k3, kb1, kb2, kb3 = jax.random.split(key, 6)

    def glorot(k, shape):
        limit = jnp.sqrt(6.0 / (shape[0] + shape[1]))
        return jax.random.uniform(k, shape, jnp.float32, -limit, limit)

    w1 = glorot(k1, (num_features, hidden_dim))
    w2 = glorot(k2, (hidden_dim, hidden_dim))
    w3 = glorot(k3, (hidden_dim, output_dim))
    b1 = 0.1 * jax.random.normal(kb1, (1, hidden_dim), jnp.float32)
    b2 = 0.1 * jax.random.normal(kb2, (1, hidden_dim), jnp.float32)
    b3 = 0.1 * jax.random.normal(kb3, (1, output_dim), jnp.float32)
    return (w1, b1, w2, b2, w3, b3)


def reference_forward(a_hat, x, params, pool):
    w1, b1, w2, b2, w3, b3 = params
    h = jnp.maximum(a_hat @ (x @ w1) + b1, 0.0)
    h = jnp.maximum(a_hat @ (h @ w2) + b2, 0.0)
    h = a_hat @ (h @ w3) + b3
    return pool @ h


if __name__ == "__main__":
    key = jax.random.PRNGKey(0)
    num_nodes = 200            # pads to 256
    num_features = 4
    hidden_dim = 32
    output_dim = 8
    num_graphs = 2

    k_x, k_p = jax.random.split(key, 2)

    # Deterministic node features.
    x = jax.random.normal(k_x, (num_nodes, num_features), jnp.float32)

    # Simple symmetric ring edges within each graph (no self loops).
    nodes_per_graph = num_nodes // num_graphs
    edges = []
    for gi in range(num_graphs):
        base = gi * nodes_per_graph
        for i in range(nodes_per_graph):
            a, b = base + i, base + (i + 1) % nodes_per_graph
            edges.append((a, b))
            edges.append((b, a))
    edge_index = jnp.array(edges, dtype=jnp.int32).T                 # (2, E)

    # Batch assignment: first half -> graph 0, second half -> graph 1.
    batch = jnp.repeat(jnp.arange(num_graphs, dtype=jnp.int32), nodes_per_graph)

    a_hat = build_gcn_adjacency(edge_index, num_nodes)
    pool = build_pool_matrix(batch, num_graphs)
    params = init_params(k_p, num_features, hidden_dim, output_dim)

    ref = reference_forward(a_hat, x, params, pool)

    # 1) fused single-call path (A_hat streamed once, everything VMEM resident).
    out_fused = graph_anomaly_forward(a_hat, x, params, pool)
    out_fused = jax.block_until_ready(out_fused)
    assert out_fused.shape == (num_graphs, output_dim)
    diff_fused = jnp.max(jnp.abs(out_fused - ref))
    assert jnp.allclose(out_fused, ref, atol=5e-2, rtol=5e-2), \
        f"fused path: max abs diff {diff_fused}"

    # 2) tiled per-layer path (row-strip A, resident H, parallel row tiles).
    out_tiled = graph_anomaly_forward(a_hat, x, params, pool,
                                      tile_m=128, force_tiled=True)
    out_tiled = jax.block_until_ready(out_tiled)
    assert out_tiled.shape == (num_graphs, output_dim)
    diff_tiled = jnp.max(jnp.abs(out_tiled - ref))
    assert jnp.allclose(out_tiled, ref, atol=5e-2, rtol=5e-2), \
        f"tiled path: max abs diff {diff_tiled}"

    print("KERNEL_OK")
</pallas_src>

<mosaic_0001>
module attributes {stable_mosaic.version = 11 : i64} {
  func.func @fused_gcn_pool_kernel(%arg0: i32, %arg1: memref<256x256xbf16, #tpu.memory_space<vmem>>, %arg2: memref<256x128xbf16, #tpu.memory_space<vmem>>, %arg3: memref<128x128xbf16, #tpu.memory_space<vmem>>, %arg4: memref<1x128xf32, #tpu.memory_space<vmem>>, %arg5: memref<128x128xbf16, #tpu.memory_space<vmem>>, %arg6: memref<1x128xf32, #tpu.memory_space<vmem>>, %arg7: memref<128x128xbf16, #tpu.memory_space<vmem>>, %arg8: memref<1x128xf32, #tpu.memory_space<vmem>>, %arg9: memref<8x256xf32, #tpu.memory_space<vmem>>, %arg10: memref<8x128xf32, #tpu.memory_space<vmem>>) attributes {dimension_semantics = [#tpu.dimension_semantics<arbitrary>], iteration_bounds = array<i64: 1>, scalar_prefetch = 0 : i64, scratch_operands = 0 : i64, tpu.core_type = #tpu.core_type<tc>, window_params = [{pipeline_mode = #tpu.pipeline_mode<synchronous>, transform_indices = @transform_0, window_bounds = array<i64: 256, 256>}, {pipeline_mode = #tpu.pipeline_mode<synchronous>, transform_indices = @transform_1, window_bounds = array<i64: 256, 128>}, {pipeline_mode = #tpu.pipeline_mode<synchronous>, transform_indices = @transform_2, window_bounds = array<i64: 128, 128>}, {pipeline_mode = #tpu.pipeline_mode<synchronous>, transform_indices = @transform_3, window_bounds = array<i64: 1, 128>}, {pipeline_mode = #tpu.pipeline_mode<synchronous>, transform_indices = @transform_4, window_bounds = array<i64: 128, 128>}, {pipeline_mode = #tpu.pipeline_mode<synchronous>, transform_indices = @transform_5, window_bounds = array<i64: 1, 128>}, {pipeline_mode = #tpu.pipeline_mode<synchronous>, transform_indices = @transform_6, window_bounds = array<i64: 128, 128>}, {pipeline_mode = #tpu.pipeline_mode<synchronous>, transform_indices = @transform_7, window_bounds = array<i64: 1, 128>}, {pipeline_mode = #tpu.pipeline_mode<synchronous>, transform_indices = @transform_8, window_bounds = array<i64: 8, 256>}, {pipeline_mode = #tpu.pipeline_mode<synchronous>, transform_indices = @transform_9, window_bounds = array<i64: 8, 128>}]} {
    %c0 = arith.constant 0 : index
    %c0_0 = arith.constant 0 : index
    %0 = vector.load %arg1[%c0, %c0_0] : memref<256x256xbf16, #tpu.memory_space<vmem>>, vector<256x256xbf16>
    %c0_1 = arith.constant 0 : index
    %c0_2 = arith.constant 0 : index
    %1 = vector.load %arg2[%c0_1, %c0_2] : memref<256x128xbf16, #tpu.memory_space<vmem>>, vector<256x128xbf16>
    %cst = arith.constant dense<0.000000e+00> : vector<256x128xf32>
    %2 = tpu.matmul %0, %1, %cst {dimension_numbers = #tpu.dot_dimension_numbers<[1], [0], [0], [1], [0, 0, 1, 1], [], []>} : vector<256x256xbf16>, vector<256x128xbf16>, vector<256x128xf32> -> vector<256x128xf32>
    %3 = arith.truncf %2 : vector<256x128xf32> to vector<256x128xbf16>
    %c0_3 = arith.constant 0 : index
    %c0_4 = arith.constant 0 : index
    %4 = vector.load %arg3[%c0_3, %c0_4] : memref<128x128xbf16, #tpu.memory_space<vmem>>, vector<128x128xbf16>
    %cst_5 = arith.constant dense<0.000000e+00> : vector<256x128xf32>
    %5 = tpu.matmul %3, %4, %cst_5 {dimension_numbers = #tpu.dot_dimension_numbers<[1], [0], [0], [1], [0, 0, 1, 1], [], []>} : vector<256x128xbf16>, vector<128x128xbf16>, vector<256x128xf32> -> vector<256x128xf32>
    %c0_6 = arith.constant 0 : index
    %c0_7 = arith.constant 0 : index
    %6 = vector.load %arg4[%c0_6, %c0_7] : memref<1x128xf32, #tpu.memory_space<vmem>>, vector<1x128xf32>
    %7 = vector.broadcast %6 : vector<1x128xf32> to vector<256x128xf32>
    %8 = arith.addf %5, %7 : vector<256x128xf32>
    %cst_8 = arith.constant 0.000000e+00 : f32
    %9 = vector.broadcast %cst_8 : f32 to vector<256x128xf32>
    %10 = arith.maximumf %8, %9 : vector<256x128xf32>
    %11 = arith.truncf %10 : vector<256x128xf32> to vector<256x128xbf16>
    %cst_9 = arith.constant dense<0.000000e+00> : vector<256x128xf32>
    %12 = tpu.matmul %0, %11, %cst_9 {dimension_numbers = #tpu.dot_dimension_numbers<[1], [0], [0], [1], [0, 0, 1, 1], [], []>} : vector<256x256xbf16>, vector<256x128xbf16>, vector<256x128xf32> -> vector<256x128xf32>
    %13 = arith.truncf %12 : vector<256x128xf32> to vector<256x128xbf16>
    %c0_10 = arith.constant 0 : index
    %c0_11 = arith.constant 0 : index
    %14 = vector.load %arg5[%c0_10, %c0_11] : memref<128x128xbf16, #tpu.memory_space<vmem>>, vector<128x128xbf16>
    %cst_12 = arith.constant dense<0.000000e+00> : vector<256x128xf32>
    %15 = tpu.matmul %13, %14, %cst_12 {dimension_numbers = #tpu.dot_dimension_numbers<[1], [0], [0], [1], [0, 0, 1, 1], [], []>} : vector<256x128xbf16>, vector<128x128xbf16>, vector<256x128xf32> -> vector<256x128xf32>
    %c0_13 = arith.constant 0 : index
    %c0_14 = arith.constant 0 : index
    %16 = vector.load %arg6[%c0_13, %c0_14] : memref<1x128xf32, #tpu.memory_space<vmem>>, vector<1x128xf32>
    %17 = vector.broadcast %16 : vector<1x128xf32> to vector<256x128xf32>
    %18 = arith.addf %15, %17 : vector<256x128xf32>
    %cst_15 = arith.constant 0.000000e+00 : f32
    %19 = vector.broadcast %cst_15 : f32 to vector<256x128xf32>
    %20 = arith.maximumf %18, %19 : vector<256x128xf32>
    %21 = arith.truncf %20 : vector<256x128xf32> to vector<256x128xbf16>
    %cst_16 = arith.constant dense<0.000000e+00> : vector<256x128xf32>
    %22 = tpu.matmul %0, %21, %cst_16 {dimension_numbers = #tpu.dot_dimension_numbers<[1], [0], [0], [1], [0, 0, 1, 1], [], []>} : vector<256x256xbf16>, vector<256x128xbf16>, vector<256x128xf32> -> vector<256x128xf32>
    %23 = arith.truncf %22 : vector<256x128xf32> to vector<256x128xbf16>
    %c0_17 = arith.constant 0 : index
    %c0_18 = arith.constant 0 : index
    %24 = vector.load %arg7[%c0_17, %c0_18] : memref<128x128xbf16, #tpu.memory_space<vmem>>, vector<128x128xbf16>
    %cst_19 = arith.constant dense<0.000000e+00> : vector<256x128xf32>
    %25 = tpu.matmul %23, %24, %cst_19 {dimension_numbers = #tpu.dot_dimension_numbers<[1], [0], [0], [1], [0, 0, 1, 1], [], []>} : vector<256x128xbf16>, vector<128x128xbf16>, vector<256x128xf32> -> vector<256x128xf32>
    %c0_20 = arith.constant 0 : index
    %c0_21 = arith.constant 0 : index
    %26 = vector.load %arg8[%c0_20, %c0_21] : memref<1x128xf32, #tpu.memory_space<vmem>>, vector<1x128xf32>
    %27 = vector.broadcast %26 : vector<1x128xf32> to vector<256x128xf32>
    %28 = arith.addf %25, %27 : vector<256x128xf32>
    %c0_22 = arith.constant 0 : index
    %c0_23 = arith.constant 0 : index
    %29 = vector.load %arg9[%c0_22, %c0_23] : memref<8x256xf32, #tpu.memory_space<vmem>>, vector<8x256xf32>
    %cst_24 = arith.constant dense<0.000000e+00> : vector<8x128xf32>
    %30 = tpu.matmul %29, %28, %cst_24 {dimension_numbers = #tpu.dot_dimension_numbers<[1], [0], [0], [1], [0, 0, 1, 1], [], []>} : vector<8x256xf32>, vector<256x128xf32>, vector<8x128xf32> -> vector<8x128xf32>
    %c0_25 = arith.constant 0 : index
    %c0_26 = arith.constant 0 : index
    %31 = vector.load %arg10[%c0_25, %c0_26] : memref<8x128xf32, #tpu.memory_space<vmem>>, vector<8x128xf32>
    tpu.vector_store %arg10[%c0_25, %c0_26], %30 {strides = array<i32>} : memref<8x128xf32, #tpu.memory_space<vmem>>, vector<8x128xf32>,
    return
  }
  func.func @transform_0(%arg0: i32) -> (i32, i32) {
    %c0_i32 = arith.constant 0 : i32
    %c0_i32_0 = arith.constant 0 : i32
    %c0_i32_1 = arith.constant 0 : i32
    return %c0_i32, %c0_i32_0 : i32, i32
  }
  func.func @transform_1(%arg0: i32) -> (i32, i32) {
    %c0_i32 = arith.constant 0 : i32
    %c0_i32_0 = arith.constant 0 : i32
    %c0_i32_1 = arith.constant 0 : i32
    return %c0_i32, %c0_i32_0 : i32, i32
  }
  func.func @transform_2(%arg0: i32) -> (i32, i32) {
    %c0_i32 = arith.constant 0 : i32
    %c0_i32_0 = arith.constant 0 : i32
    %c0_i32_1 = arith.constant 0 : i32
    return %c0_i32, %c0_i32_0 : i32, i32
  }
  func.func @transform_3(%arg0: i32) -> (i32, i32) {
    %c0_i32 = arith.constant 0 : i32
    %c0_i32_0 = arith.constant 0 : i32
    %c0_i32_1 = arith.constant 0 : i32
    return %c0_i32, %c0_i32_0 : i32, i32
  }
  func.func @transform_4(%arg0: i32) -> (i32, i32) {
    %c0_i32 = arith.constant 0 : i32
    %c0_i32_0 = arith.constant 0 : i32
    %c0_i32_1 = arith.constant 0 : i32
    return %c0_i32, %c0_i32_0 : i32, i32
  }
  func.func @transform_5(%arg0: i32) -> (i32, i32) {
    %c0_i32 = arith.constant 0 : i32
    %c0_i32_0 = arith.constant 0 : i32
    %c0_i32_1 = arith.constant 0 : i32
    return %c0_i32, %c0_i32_0 : i32, i32
  }
  func.func @transform_6(%arg0: i32) -> (i32, i32) {
    %c0_i32 = arith.constant 0 : i32
    %c0_i32_0 = arith.constant 0 : i32
    %c0_i32_1 = arith.constant 0 : i32
    return %c0_i32, %c0_i32_0 : i32, i32
  }
  func.func @transform_7(%arg0: i32) -> (i32, i32) {
    %c0_i32 = arith.constant 0 : i32
    %c0_i32_0 = arith.constant 0 : i32
    %c0_i32_1 = arith.constant 0 : i32
    return %c0_i32, %c0_i32_0 : i32, i32
  }
  func.func @transform_8(%arg0: i32) -> (i32, i32) {
    %c0_i32 = arith.constant 0 : i32
    %c0_i32_0 = arith.constant 0 : i32
    %c0_i32_1 = arith.constant 0 : i32
    return %c0_i32, %c0_i32_0 : i32, i32
  }
  func.func @transform_9(%arg0: i32) -> (i32, i32) {
    %c0_i32 = arith.constant 0 : i32
    %c0_i32_0 = arith.constant 0 : i32
    %c0_i32_1 = arith.constant 0 : i32
    return %c0_i32, %c0_i32_0 : i32, i32
  }
}

</mosaic_0001>

<bundles_post_ra>
// kernel: tpu_custom_call.1
= control target key start
LH: loop header
LB: loop body
LE: loop exit
PB: predicated region body
PF: predicated region fallthrough
CT: control target
= control target key end

     0   :  { %14 = vsyncpa [#allocation3], 0  ;;  %s2664_s0 = inlined_call_operand.hbm [shape: bf16[256,256], index: 0, kind: input, shape index: {}]   ;;  %s2665_s1 = inlined_call_operand.hbm [shape: bf16[256,128], index: 1, kind: input, shape index: {}]   ;;  %s2666_s2 = inlined_call_operand.hbm [shape: bf16[128,128], index: 2, kind: input, shape index: {}]   ;;  %s2667_s3 = inlined_call_operand.vmem [shape: f32[1,128], index: 3, kind: input, shape index: {}]   ;;  %s2668_s4 = inlined_call_operand.hbm [shape: bf16[128,128], index: 4, kind: input, shape index: {}]   ;;  %s2669_s5 = inlined_call_operand.vmem [shape: f32[1,128], index: 5, kind: input, shape index: {}]   ;;  %s2670_s6 = inlined_call_operand.hbm [shape: bf16[128,128], index: 6, kind: input, shape index: {}]   ;;  %s2671_s7 = inlined_call_operand.vmem [shape: f32[1,128], index: 7, kind: input, shape index: {}]   ;;  %s2672_s8 = inlined_call_operand.hbm [shape: f32[8,256], index: 8, kind: input, shape index: {}]   ;;  %s2673_s9 = inlined_call_operand.hbm [shape: f32[8,128], index: 9, kind: output, shape index: {}]  }
   0x1   :  { %15 = vsyncpa [#allocation6], 0 }
   0x2   :  { %16 = vsyncpa [#allocation9], 0 }
   0x3   :  { %17 = vsyncpa [#allocation12], 0  ;;  %s36_s11 = sshll.u32 %s2665_s1, 4  ;;  %s37_s11 = int_to_ptr.hbm [resolvable:$true] %s36_s11 }
   0x4   :  { %18 = vsyncpa [#allocation4], 0  ;;  %s2233_s12 = smov [#allocation5]   ;;  %s64_s16 = sshll.u32 %s2668_s4, 4  ;;  %s65_s16 = int_to_ptr.hbm [resolvable:$true] %s64_s16 }
   0x5   :  { %s38_s13 = sshll.u32 %s2233_s12, 4  ;;  %s2234_s17 = smov 64   ;;  %s39_s13 = int_to_ptr.vmem [resolvable:$true] %s38_s13 }
   0x6   :  { %s2235_s18 = smov 4   ;;  %s2236_s19 = smov [#allocation8]  }
   0x7   :  { %44 = dma.hbm_to_vmem [thread:$0]  %s37_s11, 2048, %s39_s13, [#allocation6], %s2234_s17, %s2234_s17, %s2235_s18  }
   0x8   :  { %s66_s20 = sshll.u32 %s2236_s19, 4  ;;  %s23_s22 = sshll.u32 %s2664_s0, 4  ;;  %s67_s20 = int_to_ptr.vmem [resolvable:$true] %s66_s20  ;;  %s24_s22 = int_to_ptr.hbm [resolvable:$true] %s23_s22 }
   0x9   :  { %72 = dma.hbm_to_vmem [thread:$0]  %s65_s16, 1024, %s67_s20, [#allocation9], %s2234_s17, %s2234_s17, %s2235_s18  }
   0xa   :  { %s2237_s4 = smov [#allocation2]   ;;  %s49_s26 = sshll.u32 %s2666_s2, 4  ;;  %s50_s26 = int_to_ptr.hbm [resolvable:$true] %s49_s26 }
   0xb   :  { %s25_s23 = sshll.u32 %s2237_s4, 4  ;;  %s2238_s27 = smov 128   ;;  %s26_s23 = int_to_ptr.vmem [resolvable:$true] %s25_s23 }
   0xc   :  { %s2239_s28 = smov 8   ;;  %s2240_s29 = smov [#allocation7]  }
   0xd   :  { %31 = dma.hbm_to_vmem [thread:$0]  %s24_s22, 4096, %s26_s23, [#allocation3], %s2238_s27, %s2238_s27, %s2239_s28  }
   0xe   :  { %s51_s30 = sshll.u32 %s2240_s29, 4  ;;  %s79_s11 = sshll.u32 %s2670_s6, 4  ;;  %s52_s30 = int_to_ptr.vmem [resolvable:$true] %s51_s30  ;;  %s80_s11 = int_to_ptr.hbm [resolvable:$true] %s79_s11 }
   0xf   :  { %57 = dma.hbm_to_vmem [thread:$0]  %s50_s26, 1024, %s52_s30, [#allocation6], %s2234_s17, %s2234_s17, %s2235_s18  }
  0x10   :  { %s95_s2 = sshll.u32 %s2672_s8, 4  ;;  %s2241_s14 = smov [#allocation10]   ;;  %s96_s2 = int_to_ptr.hbm [resolvable:$true] %s95_s2 }
  0x11   :  { %s81_s15 = sshll.u32 %s2241_s14, 4  ;;  %s2242_s16 = smov [#allocation11]   ;;  %s82_s15 = int_to_ptr.vmem [resolvable:$true] %s81_s15 }
  0x12   :  { %87 = dma.hbm_to_vmem [thread:$0]  %s80_s11, 1024, %s82_s15, [#allocation9], %s2234_s17, %s2234_s17, %s2235_s18  }
  0x13   :  { %s97_s6 = sshll.u32 %s2242_s16, 4  ;;  %s98_s6 = int_to_ptr.vmem [resolvable:$true] %s97_s6 }
  0x14   :  { %100 = dma.hbm_to_vmem [thread:$0]  %s96_s2, 256, %s98_s6, [#allocation12]  }
  0x15   :  { %2223 = dma.done.wait [#allocation3], 4096  }
  0x16   :  { %2224 = vsyncadd [#allocation3], 4294963200 }
  0x17   :  { %2225 = dma.done.wait [#allocation6], 3072  }
  0x18   :  { %2226 = vsyncadd [#allocation6], 4294964224 }
  0x19   :  { %2227 = dma.done.wait [#allocation9], 2048  }
  0x1a   :  { %2228 = vsyncadd [#allocation9], 4294965248 }
  0x1b   :  { %2229 = dma.done.wait [#allocation12], 256  }
  0x1c   :  { %2230 = vsyncadd [#allocation12], 4294967040  ;;  %v1984_v0 = vld [vmem:[#allocation5 + $0x38] sm:$0xff]  ;;  %v1983_v1 = vld [vmem:[#allocation5 + $0x30] sm:$0xff]  ;;  %s1644_s22 = sshll.u32 %s2673_s9, 4  ;;  %s1645_s22 = int_to_ptr.hbm [resolvable:$true] %s1644_s22 }
  0x1d   :  { %2017 = vmatpush.bf16.msra.mxu1 %v1984_v0  ;;  %445 = vmatpush.bf16.msra.mxu0 %v1984_v0  ;;  %v1982_v2 = vld [vmem:[#allocation5 + $0x28] sm:$0xff]  ;;  %v1981_v3 = vld [vmem:[#allocation5 + $0x20] sm:$0xff]  ;;  %v1980_v4 = vld [vmem:[#allocation5 + $0x18] sm:$0xff] }
  0x1e   :  { %2018 = vmatpush.bf16.msra.mxu2 %v1984_v0  ;;  %2019 = vmatpush.bf16.msra.mxu3 %v1984_v0  ;;  %v1979_v5 = vld [vmem:[#allocation5 + $0x10] sm:$0xff]  ;;  %v1978_v6 = vld [vmem:[#allocation5 + $0x8] sm:$0xff]  ;;  %v1977_v7 = vld [vmem:[#allocation5] sm:$0xff] }
  0x1f   :  { %v1699_v8 = vld [vmem:[#allocation2 + $0x50] sm:$0xf]  ;;  %v1956_v9 = vld [vmem:[#allocation2 + $0x54] sm:$0xf0]  ;;  %v1659_v10 = vld [vmem:[#allocation2] sm:$0xf] }
  0x20   :  { %v1946_v11 = vld [vmem:[#allocation2 + $0x4] sm:$0xf0]  ;;  %v1992_v12 = vld [vmem:[#allocation5 + $0x78] sm:$0xff]  ;;  %v2324_v13 = vor.u32 %v1956_v9, %v1699_v8  ;;  %v1991_v15 = vld [vmem:[#allocation5 + $0x70] sm:$0xff] }
  0x21   :  { %2020 = vmatpush.bf16.msra.mxu1 %v1983_v1  ;;  %446 = vmatpush.bf16.msra.mxu0 %v1983_v1  ;;  %v2326_v14 = vor.u32 %v1946_v11, %v1659_v10  ;;  %v1990_v16 = vld [vmem:[#allocation5 + $0x68] sm:$0xff]  ;;  %v1989_v17 = vld [vmem:[#allocation5 + $0x60] sm:$0xff]  ;;  %v1667_v20 = vld [vmem:[#allocation2 + $0x10] sm:$0xf] }
  0x22   :  { %2021 = vmatpush.bf16.msra.mxu2 %v1983_v1  ;;  %2022 = vmatpush.bf16.msra.mxu3 %v1983_v1  ;;  %v1707_v18 = vld [vmem:[#allocation2 + $0x60] sm:$0xf]  ;;  %v1958_v19 = vld [vmem:[#allocation2 + $0x64] sm:$0xf0]  ;;  %v1948_v21 = vld [vmem:[#allocation2 + $0x14] sm:$0xf0] }
  0x23   :  { %v1988_v22 = vld [vmem:[#allocation5 + $0x58] sm:$0xff]  ;;  %v2330_v23 = vor.u32 %v1958_v19, %v1707_v18  ;;  %v2332_v24 = vor.u32 %v1948_v21, %v1667_v20  ;;  %v1987_v25 = vld [vmem:[#allocation5 + $0x50] sm:$0xff]  ;;  %v1986_v26 = vld [vmem:[#allocation5 + $0x48] sm:$0xff] }
  0x24   :  { %v1985_v27 = vld [vmem:[#allocation5 + $0x40] sm:$0xff]  ;;  %v1661_v29 = vld [vmem:[#allocation2 + $0x8] sm:$0xf0]  ;;  %v1950_v31 = vld [vmem:[#allocation2 + $0x24] sm:$0xf0] }
  0x25   :  { %2023 = vmatpush.bf16.msra.mxu1 %v1982_v2  ;;  %447 = vmatpush.bf16.msra.mxu0 %v1982_v2  ;;  %v1945_v28 = vld [vmem:[#allocation2 + $0x4] sm:$0xf]  ;;  %v1675_v30 = vld [vmem:[#allocation2 + $0x20] sm:$0xf]  ;;  %v1947_v34 = vld [vmem:[#allocation2 + $0x14] sm:$0xf] }
  0x26   :  { %2024 = vmatpush.bf16.msra.mxu2 %v1982_v2  ;;  %2025 = vmatpush.bf16.msra.mxu3 %v1982_v2  ;;  %v2336_v32 = vor.u32 %v1945_v28, %v1661_v29  ;;  %v2338_v33 = vor.u32 %v1950_v31, %v1675_v30  ;;  %v1669_v35 = vld [vmem:[#allocation2 + $0x18] sm:$0xf0]  ;;  %v1683_v36 = vld [vmem:[#allocation2 + $0x30] sm:$0xf]  ;;  %v1952_v37 = vld [vmem:[#allocation2 + $0x34] sm:$0xf0] }
  0x27   :  { %v2342_v38 = vor.u32 %v1947_v34, %v1669_v35  ;;  %v2344_v39 = vor.u32 %v1952_v37, %v1683_v36  ;;  %v1949_v40 = vld [vmem:[#allocation2 + $0x24] sm:$0xf]  ;;  %v1677_v41 = vld [vmem:[#allocation2 + $0x28] sm:$0xf0]  ;;  %v1691_v42 = vld [vmem:[#allocation2 + $0x40] sm:$0xf] }
  0x28   :  { %v1954_v43 = vld [vmem:[#allocation2 + $0x44] sm:$0xf0]  ;;  %v2348_v44 = vor.u32 %v1949_v40, %v1677_v41  ;;  %v1715_v46 = vld [vmem:[#allocation2 + $0x70] sm:$0xf]  ;;  %v1960_v47 = vld [vmem:[#allocation2 + $0x74] sm:$0xf0] }
  0x29   :  { %2026 = vmatpush.bf16.msra.mxu1 %v1981_v3  ;;  %448 = vmatpush.bf16.msra.mxu0 %v1981_v3  ;;  %v2350_v45 = vor.u32 %v1954_v43, %v1691_v42  ;;  %v2354_v48 = vor.u32 %v1960_v47, %v1715_v46  ;;  %v1951_v49 = vld [vmem:[#allocation2 + $0x34] sm:$0xf]  ;;  %v1685_v50 = vld [vmem:[#allocation2 + $0x38] sm:$0xf0]  ;;  %v1723_v52 = vld [vmem:[#allocation2 + $0x80] sm:$0xf] }
  0x2a   :  { %2027 = vmatpush.bf16.msra.mxu2 %v1981_v3  ;;  %2028 = vmatpush.bf16.msra.mxu3 %v1981_v3  ;;  %v2357_v51 = vor.u32 %v1951_v49, %v1685_v50  ;;  %v1962_v53 = vld [vmem:[#allocation2 + $0x84] sm:$0xf0]  ;;  %v1953_v55 = vld [vmem:[#allocation2 + $0x44] sm:$0xf]  ;;  %v1693_v56 = vld [vmem:[#allocation2 + $0x48] sm:$0xf0] }
  0x2b   :  { %v2360_v54 = vor.u32 %v1962_v53, %v1723_v52  ;;  %v2363_v57 = vor.u32 %v1953_v55, %v1693_v56  ;;  %v1731_v58 = vld [vmem:[#allocation2 + $0x90] sm:$0xf]  ;;  %v1964_v59 = vld [vmem:[#allocation2 + $0x94] sm:$0xf0]  ;;  %v1955_v62 = vld [vmem:[#allocation2 + $0x54] sm:$0xf] }
  0x2c   :  { %v2366_v60 = vor.u32 %v1964_v59, %v1731_v58  ;;  %v2000_v61 = vld [vmem:[#allocation7 + $0x38] sm:$0xff]  ;;  %v1999_v1 = vld [vmem:[#allocation7 + $0x30] sm:$0xff]  ;;  %v1739_v2 = vld [vmem:[#allocation2 + $0xa0] sm:$0xf] }
  0x2d   :  { %2029 = vmatpush.bf16.msra.mxu1 %v1980_v4  ;;  %449 = vmatpush.bf16.msra.mxu0 %v1980_v4  ;;  %v1701_v63 = vld [vmem:[#allocation2 + $0x58] sm:$0xf0]  ;;  %v1966_v3 = vld [vmem:[#allocation2 + $0xa4] sm:$0xf0]  ;;  %v1957_v8 = vld [vmem:[#allocation2 + $0x64] sm:$0xf] }
  0x2e   :  { %2030 = vmatpush.bf16.msra.mxu2 %v1980_v4  ;;  %2031 = vmatpush.bf16.msra.mxu3 %v1980_v4  ;;  %v2369_v0 = vor.u32 %v1955_v62, %v1701_v63  ;;  %v2372_v4 = vor.u32 %v1966_v3, %v1739_v2  ;;  %v1709_v9 = vld [vmem:[#allocation2 + $0x68] sm:$0xf0]  ;;  %v1959_v18 = vld [vmem:[#allocation2 + $0x74] sm:$0xf]  ;;  %v1717_v19 = vld [vmem:[#allocation2 + $0x78] sm:$0xf0] }
  0x2f   :  { %v2375_v10 = vor.u32 %v1957_v8, %v1709_v9  ;;  %v2382_v21 = vor.u32 %v1959_v18, %v1717_v19  ;;  %v1725_v28 = vld [vmem:[#allocation2 + $0x88] sm:$0xf0]  ;;  %v1747_v34 = vld [vmem:[#allocation2 + $0xb0] sm:$0xf]  ;;  %v1968_v35 = vld [vmem:[#allocation2 + $0xb4] sm:$0xf0] }
  0x30   :  { %v2392_v36 = vor.u32 %v1968_v35, %v1747_v34  ;;  %v1963_v46 = vld [vmem:[#allocation2 + $0x94] sm:$0xf]  ;;  %v1733_v47 = vld [vmem:[#allocation2 + $0x98] sm:$0xf0]  ;;  %v1755_v52 = vld [vmem:[#allocation2 + $0xc0] sm:$0xf] }
  0x31   :  { %2032 = vmatpush.bf16.msra.mxu1 %v1979_v5  ;;  %450 = vmatpush.bf16.msra.mxu0 %v1979_v5  ;;  %v2395_v49 = vor.u32 %v1963_v46, %v1733_v47  ;;  %v1970_v53 = vld [vmem:[#allocation2 + $0xc4] sm:$0xf0]  ;;  %v1965_v63 = vld [vmem:[#allocation2 + $0xa4] sm:$0xf]  ;;  %v1967_v19 = vld [vmem:[#allocation2 + $0xb4] sm:$0xf] }
  0x32   :  { %2033 = vmatpush.bf16.msra.mxu2 %v1979_v5  ;;  %2034 = vmatpush.bf16.msra.mxu3 %v1979_v5  ;;  %v1998_v5 = vld [vmem:[#allocation7 + $0x28] sm:$0xff]  ;;  %v2398_v55 = vor.u32 %v1970_v53, %v1755_v52  ;;  %v1779_v53 = vld [vmem:[#allocation2 + $0xf0] sm:$0xf] }
  0x35   :  { %2035 = vmatpush.bf16.msra.mxu1 %v1978_v6  ;;  %451 = vmatpush.bf16.msra.mxu0 %v1978_v6 }
  0x36   :  { %2036 = vmatpush.bf16.msra.mxu2 %v1978_v6  ;;  %2037 = vmatpush.bf16.msra.mxu3 %v1978_v6  ;;  %v1997_v6 = vld [vmem:[#allocation7 + $0x20] sm:$0xff] }
  0x39   :  { %2038 = vmatpush.bf16.msra.mxu1 %v1977_v7  ;;  %452 = vmatpush.bf16.msra.mxu0 %v1977_v7 }
  0x3a   :  { %2039 = vmatpush.bf16.msra.mxu2 %v1977_v7  ;;  %2040 = vmatpush.bf16.msra.mxu3 %v1977_v7  ;;  %v1996_v7 = vld [vmem:[#allocation7 + $0x18] sm:$0xff] }
  0x3c   :  { %478 = vmatmul.bf16.vlgmr.msra.gmra.mxu1 %v2324_v13  ;;  %453 = vmatmul.bf16.vlgmr.msra.gmra.mxu0 %v2326_v14 }
  0x3d   :  { %534 = vmatpush.bf16.msrb.mxu1 %v1992_v12  ;;  %488 = vmatmul.bf16.vlgmr.msra.gmra.mxu2 %v2354_v48  ;;  %v1995_v12 = vld [vmem:[#allocation7 + $0x10] sm:$0xff] }
  0x3e   :  { %707 = vmatpush.bf16.msrb.mxu2 %v2000_v61  ;;  %508 = vmatmul.bf16.vlgmr.msra.gmra.mxu3 %v2392_v36 }
  0x41   :  { %535 = vmatpush.bf16.msrb.mxu1 %v1991_v15  ;;  %v1994_v15 = vld [vmem:[#allocation7 + $0x8] sm:$0xff] }
  0x42   :  { %708 = vmatpush.bf16.msrb.mxu2 %v1999_v1  ;;  %v1741_v1 = vld [vmem:[#allocation2 + $0xa8] sm:$0xf0] }
  0x43   :  { %v2401_v2 = vor.u32 %v1965_v63, %v1741_v1 }
  0x45   :  { %536 = vmatpush.bf16.msrb.mxu1 %v1990_v16 }
  0x46   :  { %709 = vmatpush.bf16.msrb.mxu2 %v1998_v5 }
  0x49   :  { %537 = vmatpush.bf16.msrb.mxu1 %v1989_v17  ;;  %v1993_v17 = vld [vmem:[#allocation7] sm:$0xff] }
  0x4a   :  { %710 = vmatpush.bf16.msrb.mxu2 %v1997_v6  ;;  %v1763_v6 = vld [vmem:[#allocation2 + $0xd0] sm:$0xf] }
  0x4c   :  { %483 = vmatmul.bf16.gmra.mxu1 %v2330_v23  ;;  %458 = vmatmul.bf16.gmra.mxu0 %v2332_v24 }
  0x4d   :  { %538 = vmatpush.bf16.msrb.mxu1 %v1988_v22  ;;  %493 = vmatmul.bf16.gmra.mxu2 %v2360_v54 }
  0x4e   :  { %711 = vmatpush.bf16.msrb.mxu2 %v1996_v7  ;;  %513 = vmatmul.bf16.gmra.mxu3 %v2398_v55  ;;  %v1972_v7 = vld [vmem:[#allocation2 + $0xd4] sm:$0xf0] }
  0x4f   :  { %v2404_v8 = vor.u32 %v1972_v7, %v1763_v6  ;;  %v1765_v6 = vld [vmem:[#allocation2 + $0xd8] sm:$0xf0] }
  0x51   :  { %539 = vmatpush.bf16.msrb.mxu1 %v1987_v25 }
  0x52   :  { %712 = vmatpush.bf16.msrb.mxu2 %v1995_v12 }
  0x55   :  { %540 = vmatpush.bf16.msrb.mxu1 %v1986_v26 }
  0x56   :  { %713 = vmatpush.bf16.msrb.mxu2 %v1994_v15 }
  0x59   :  { %541 = vmatpush.bf16.msrb.mxu1 %v1985_v27  ;;  %v1961_v27 = vld [vmem:[#allocation2 + $0x84] sm:$0xf] }
  0x5a   :  { %714 = vmatpush.bf16.msrb.mxu2 %v1993_v17  ;;  %v2389_v29 = vor.u32 %v1961_v27, %v1725_v28  ;;  %v1771_v28 = vld [vmem:[#allocation2 + $0xe0] sm:$0xf] }
  0x5c   :  { %542 = vmatmul.bf16.vlgmr.msrb.gmra.mxu1 %v2336_v32  ;;  %463 = vmatmul.bf16.gmra.mxu0 %v2338_v33 }
  0x5d   :  { %498 = vmatmul.bf16.gmra.mxu2 %v2366_v60 }
  0x5e   :  { %518 = vmatmul.bf16.gmra.mxu3 %v2404_v8 }
  0x6c   :  { %547 = vmatmul.bf16.gmra.mxu1 %v2342_v38  ;;  %468 = vmatmul.bf16.gmra.mxu0 %v2344_v39 }
  0x6d   :  { %503 = vmatmul.bf16.gmra.mxu2 %v2372_v4 }
  0x7c   :  { %552 = vmatmul.bf16.gmra.mxu1 %v2348_v44  ;;  %473 = vmatmul.bf16.gmra.mxu0 %v2350_v45 }
  0x8c   :  { %557 = vmatmul.bf16.gmra.mxu1 %v2357_v51 }
  0x9c   :  { %562 = vmatmul.bf16.gmra.mxu1 %v2363_v57 }
  0xac   :  { %567 = vmatmul.bf16.gmra.mxu1 %v2369_v0 }
  0xb9   :  { %v2377_v11 = vpop.f32.mrf.mxu1  ;;  %v454_v20 = vpop.f32.mrf.mxu0 }
  0xbc   :  { %572 = vmatmul.bf16.gmra.mxu1 %v2375_v10 }
  0xc0   :  { %v489_v52 = vpop.f32.mrf.mxu2 }
  0xc1   :  { %v2380_v16 = vpop.f32.mrf.mxu1  ;;  %v456_v26 = vpop.f32.mrf.mxu0 }
  0xc9   :  { %v2384_v22 = vpop.f32.mrf.mxu1  ;;  %v459_v31 = vpop.f32.mrf.mxu0 }
  0xcc   :  { %577 = vmatmul.bf16.gmra.mxu1 %v2382_v21 }
  0xd1   :  { %v2387_v25 = vpop.f32.mrf.mxu1  ;;  %v461_v43 = vpop.f32.mrf.mxu0 }
  0xd9   :  { %v543_v30 = vpop.f32.mrf.mxu1  ;;  %v464_v56 = vpop.f32.mrf.mxu0 }
  0xda   :  { %v544_v40 = vadd.f32 %v543_v30, %v454_v20  ;;  %v1749_v20 = vld [vmem:[#allocation2 + $0xb8] sm:$0xf0]  ;;  %v1974_v30 = vld [vmem:[#allocation2 + $0xe4] sm:$0xf0] }
  0xdc   :  { %582 = vmatmul.bf16.gmra.mxu1 %v2389_v29 }
  0xe1   :  { %v545_v37 = vpop.f32.mrf.mxu1  ;;  %v466_v3 = vpop.f32.mrf.mxu0 }
  0xe2   :  { %v546_v41 = vadd.f32 %v545_v37, %v456_v26  ;;  %v2407_v26 = vor.u32 %v1967_v19, %v1749_v20  ;;  %v1973_v20 = vld [vmem:[#allocation2 + $0xe4] sm:$0xf] }
  0xe4   :  { %v623_v42 = vpack.c.bf16 %v546_v41, %v544_v40 }
  0xe6   :  { %715 = vmatmul.bf16.vlgmr.msrb.gmra.mxu2 %v623_v42  ;;  %v1969_v42 = vld [vmem:[#allocation2 + $0xc4] sm:$0xf] }
  0xe9   :  { %v548_v50 = vpop.f32.mrf.mxu1  ;;  %v469_v17 = vpop.f32.mrf.mxu0 }
  0xea   :  { %v549_v59 = vadd.f32 %v548_v50, %v459_v31  ;;  %v2410_v31 = vor.u32 %v1974_v30, %v1771_v28 }
  0xec   :  { %587 = vmatmul.bf16.gmra.mxu1 %v2395_v49  ;;  %523 = vmatmul.bf16.gmra.mxu3 %v2410_v31 }
  0xf1   :  { %v550_v58 = vpop.f32.mrf.mxu1  ;;  %v471_v34 = vpop.f32.mrf.mxu0 }
  0xf2   :  { %v551_v61 = vadd.f32 %v550_v58, %v461_v43  ;;  %v1757_v43 = vld [vmem:[#allocation2 + $0xc8] sm:$0xf0] }
  0xf3   :  { %v2413_v47 = vor.u32 %v1969_v42, %v1757_v43  ;;  %v1781_v43 = vld [vmem:[#allocation2 + $0xf8] sm:$0xf0] }
  0xf4   :  { %v624_v62 = vpack.c.bf16 %v551_v61, %v549_v59 }
  0xf6   :  { %720 = vmatmul.bf16.gmra.mxu2 %v624_v62 }
  0xf9   :  { %v553_v5 = vpop.f32.mrf.mxu1  ;;  %v474_v46 = vpop.f32.mrf.mxu0 }
  0xfa   :  { %v554_v12 = vadd.f32 %v553_v5, %v464_v56  ;;  %v1976_v56 = vld [vmem:[#allocation2 + $0xf4] sm:$0xf0]  ;;  %v1971_v5 = vld [vmem:[#allocation2 + $0xd4] sm:$0xf] }
  0xfb   :  { %v2416_v58 = vor.u32 %v1976_v56, %v1779_v53  ;;  %v2419_v7 = vor.u32 %v1971_v5, %v1765_v6 }
  0xfc   :  { %592 = vmatmul.bf16.gmra.mxu1 %v2401_v2 }
  0xfd   :  { %528 = vmatmul.bf16.gmra.mxu3 %v2416_v58 }
 0x101   :  { %v555_v9 = vpop.f32.mrf.mxu1  ;;  %v476_v59 = vpop.f32.mrf.mxu0 }
 0x102   :  { %v556_v15 = vadd.f32 %v555_v9, %v466_v3  ;;  %v491_v3 = vpop.f32.mrf.mxu2 }
 0x104   :  { %v625_v18 = vpack.c.bf16 %v556_v15, %v554_v12 }
 0x106   :  { %725 = vmatmul.bf16.gmra.mxu2 %v625_v18 }
 0x109   :  { %v558_v27 = vpop.f32.mrf.mxu1 }
 0x10a   :  { %v559_v37 = vadd.f32 %v558_v27, %v469_v17  ;;  %v494_v12 = vpop.f32.mrf.mxu2  ;;  %v1773_v27 = vld [vmem:[#allocation2 + $0xe8] sm:$0xf0] }
 0x10b   :  { %v2424_v28 = vor.u32 %v1973_v20, %v1773_v27 }
 0x10c   :  { %597 = vmatmul.bf16.gmra.mxu1 %v2407_v26 }
 0x111   :  { %v560_v35 = vpop.f32.mrf.mxu1 }
 0x112   :  { %v561_v40 = vadd.f32 %v560_v35, %v471_v34  ;;  %v496_v30 = vpop.f32.mrf.mxu2 }
 0x114   :  { %v626_v41 = vpack.c.bf16 %v561_v40, %v559_v37 }
 0x116   :  { %730 = vmatmul.bf16.gmra.mxu2 %v626_v41 }
 0x119   :  { %v563_v50 = vpop.f32.mrf.mxu1 }
 0x11a   :  { %v564_v62 = vadd.f32 %v563_v50, %v474_v46  ;;  %v499_v41 = vpop.f32.mrf.mxu2 }
 0x11c   :  { %602 = vmatmul.bf16.gmra.mxu1 %v2413_v47 }
 0x121   :  { %v565_v61 = vpop.f32.mrf.mxu1 }
 0x122   :  { %v566_v63 = vadd.f32 %v565_v61, %v476_v59  ;;  %v501_v50 = vpop.f32.mrf.mxu2 }
 0x124   :  { %v627_v1 = vpack.c.bf16 %v566_v63, %v564_v62 }
 0x126   :  { %735 = vmatmul.bf16.gmra.mxu2 %v627_v1 }
 0x129   :  { %v568_v9 = vpop.f32.mrf.mxu1 }
 0x12a   :  { %v569_v17 = vadd.f32 %v568_v9, %v2377_v11  ;;  %v1975_v11 = vld [vmem:[#allocation2 + $0xf4] sm:$0xf]  ;;  %v504_v62 = vpop.f32.mrf.mxu2 }
 0x12c   :  { %607 = vmatmul.bf16.gmra.mxu1 %v2419_v7 }
 0x131   :  { %v570_v15 = vpop.f32.mrf.mxu1 }
 0x132   :  { %v571_v18 = vadd.f32 %v570_v15, %v2380_v16  ;;  %v2429_v16 = vor.u32 %v1975_v11, %v1781_v43  ;;  %v506_v63 = vpop.f32.mrf.mxu2 }
 0x134   :  { %v628_v19 = vpack.c.bf16 %v571_v18, %v569_v17  ;;  %v2435_v17 = vld [vmem:[%s2667_s3] ss:$0 sm:$0xff] }
 0x136   :  { %740 = vmatmul.bf16.gmra.mxu2 %v628_v19 }
 0x139   :  { %v573_v34 = vpop.f32.mrf.mxu1 }
 0x13a   :  { %v574_v37 = vadd.f32 %v573_v34, %v2384_v22 }
 0x13c   :  { %612 = vmatmul.bf16.gmra.mxu1 %v2424_v28 }
 0x141   :  { %v575_v35 = vpop.f32.mrf.mxu1 }
 0x142   :  { %v576_v40 = vadd.f32 %v575_v35, %v2387_v25  ;;  %v509_v35 = vpop.f32.mrf.mxu3 }
 0x144   :  { %v629_v42 = vpack.c.bf16 %v576_v40, %v574_v37 }
 0x146   :  { %745 = vmatmul.bf16.gmra.mxu2 %v629_v42 }
 0x149   :  { %v578_v46 = vpop.f32.mrf.mxu1 }
 0x14a   :  { %v579_v56 = vadd.f32 %v578_v46, %v489_v52  ;;  %v511_v43 = vpop.f32.mrf.mxu3 }
 0x14c   :  { %617 = vmatmul.bf16.gmra.mxu1 %v2429_v16 }
 0x151   :  { %v580_v53 = vpop.f32.mrf.mxu1 }
 0x152   :  { %v581_v59 = vadd.f32 %v580_v53, %v491_v3 }
 0x154   :  { %v630_v61 = vpack.c.bf16 %v581_v59, %v579_v56 }
 0x156   :  { %750 = vmatmul.bf16.gmra.mxu2 %v630_v61 }
 0x159   :  { %v583_v22 = vpop.f32.mrf.mxu1 }
 0x15a   :  { %v584_v1 = vadd.f32 %v583_v22, %v494_v12 }
 0x161   :  { %v585_v25 = vpop.f32.mrf.mxu1 }
 0x162   :  { %v586_v5 = vadd.f32 %v585_v25, %v496_v30 }
 0x164   :  { %v631_v6 = vpack.c.bf16 %v586_v5, %v584_v1 }
 0x166   :  { %755 = vmatmul.bf16.gmra.mxu2 %v631_v6  ;;  %v514_v6 = vpop.f32.mrf.mxu3 }
 0x169   :  { %v588_v9 = vpop.f32.mrf.mxu1  ;;  %v716_v15 = vpop.f32.mrf.mxu2 }
 0x16a   :  { %v717_v52 = vadd.f32 %v2435_v17, %v716_v15  ;;  %v589_v19 = vadd.f32 %v588_v9, %v499_v41 }
 0x16c   :  { %v796_v34 = vmax.f32 %v717_v52, 0.0 }
 0x171   :  { %v590_v3 = vpop.f32.mrf.mxu1  ;;  %v718_v18 = vpop.f32.mrf.mxu2 }
 0x172   :  { %v591_v20 = vadd.f32 %v590_v3, %v501_v50  ;;  %v719_v27 = vadd.f32 %v2435_v17, %v718_v18 }
 0x174   :  { %v632_v12 = vpack.c.bf16 %v591_v20, %v589_v19  ;;  %v797_v30 = vmax.f32 %v719_v27, 0.0  ;;  %v516_v27 = vpop.f32.mrf.mxu3 }
 0x176   :  { %760 = vmatmul.bf16.gmra.mxu2 %v632_v12  ;;  %v2439_v37 = vpack.c.bf16 %v797_v30, %v796_v34 }
 0x179   :  { %v593_v40 = vpop.f32.mrf.mxu1  ;;  %v721_v42 = vpop.f32.mrf.mxu2 }
 0x17a   :  { %v722_v11 = vadd.f32 %v2435_v17, %v721_v42  ;;  %v594_v56 = vadd.f32 %v593_v40, %v504_v62 }
 0x17c   :  { %v798_v50 = vmax.f32 %v722_v11, 0.0  ;;  %v519_v40 = vpop.f32.mrf.mxu3 }
 0x181   :  { %v595_v46 = vpop.f32.mrf.mxu1  ;;  %v723_v53 = vpop.f32.mrf.mxu2 }
 0x182   :  { %v596_v59 = vadd.f32 %v595_v46, %v506_v63  ;;  %v724_v41 = vadd.f32 %v2435_v17, %v723_v53 }
 0x184   :  { %v633_v61 = vpack.c.bf16 %v596_v59, %v594_v56  ;;  %v799_v22 = vmax.f32 %v724_v41, 0.0 }
 0x186   :  { %765 = vmatmul.bf16.gmra.mxu2 %v633_v61  ;;  %v2443_v25 = vpack.c.bf16 %v799_v22, %v798_v50  ;;  %v521_v61 = vpop.f32.mrf.mxu3 }
 0x189   :  { %v598_v1 = vpop.f32.mrf.mxu1  ;;  %v726_v5 = vpop.f32.mrf.mxu2 }
 0x18a   :  { %v727_v9 = vadd.f32 %v2435_v17, %v726_v5  ;;  %v599_v3 = vadd.f32 %v598_v1, %v509_v35 }
 0x18c   :  { %v800_v63 = vmax.f32 %v727_v9, 0.0 }
 0x191   :  { %v600_v15 = vpop.f32.mrf.mxu1  ;;  %v728_v52 = vpop.f32.mrf.mxu2 }
 0x192   :  { %v601_v18 = vadd.f32 %v600_v15, %v511_v43  ;;  %v729_v62 = vadd.f32 %v2435_v17, %v728_v52  ;;  %v524_v52 = vpop.f32.mrf.mxu3 }
 0x194   :  { %v634_v19 = vpack.c.bf16 %v601_v18, %v599_v3  ;;  %v801_v20 = vmax.f32 %v729_v62, 0.0 }
 0x196   :  { %770 = vmatmul.bf16.gmra.mxu2 %v634_v19  ;;  %v2447_v34 = vpack.c.bf16 %v801_v20, %v800_v63 }
 0x199   :  { %v603_v12 = vpop.f32.mrf.mxu1  ;;  %v731_v30 = vpop.f32.mrf.mxu2 }
 0x19a   :  { %v732_v42 = vadd.f32 %v2435_v17, %v731_v30  ;;  %v604_v53 = vadd.f32 %v603_v12, %v514_v6  ;;  %v526_v63 = vpop.f32.mrf.mxu3 }
 0x19c   :  { %v802_v43 = vmax.f32 %v732_v42, 0.0 }
 0x1a1   :  { %v605_v11 = vpop.f32.mrf.mxu1  ;;  %v733_v46 = vpop.f32.mrf.mxu2 }
 0x1a2   :  { %v606_v56 = vadd.f32 %v605_v11, %v516_v27  ;;  %v734_v35 = vadd.f32 %v2435_v17, %v733_v46  ;;  %v529_v42 = vpop.f32.mrf.mxu3 }
 0x1a4   :  { %v635_v59 = vpack.c.bf16 %v606_v56, %v604_v53  ;;  %v803_v41 = vmax.f32 %v734_v35, 0.0 }
 0x1a6   :  { %775 = vmatmul.bf16.gmra.mxu2 %v635_v59  ;;  %v831_v50 = vpack.c.bf16 %v803_v41, %v802_v43 }
 0x1a9   :  { %v608_v22 = vpop.f32.mrf.mxu1  ;;  %v736_v1 = vpop.f32.mrf.mxu2 }
 0x1aa   :  { %v609_v15 = vadd.f32 %v608_v22, %v519_v40  ;;  %v531_v53 = vpop.f32.mrf.mxu3 }
 0x1b1   :  { %v610_v5 = vpop.f32.mrf.mxu1  ;;  %v738_v9 = vpop.f32.mrf.mxu2 }
 0x1b2   :  { %v611_v3 = vadd.f32 %v610_v5, %v521_v61 }
 0x1b4   :  { %v636_v18 = vpack.c.bf16 %v611_v3, %v609_v15 }
 0x1b6   :  { %780 = vmatmul.bf16.gmra.mxu2 %v636_v18 }
 0x1b9   :  { %v613_v62 = vpop.f32.mrf.mxu1  ;;  %v741_v6 = vpop.f32.mrf.mxu2 }
 0x1ba   :  { %v614_v27 = vadd.f32 %v613_v62, %v524_v52 }
 0x1c1   :  { %v615_v19 = vpop.f32.mrf.mxu1  ;;  %v743_v20 = vpop.f32.mrf.mxu2 }
 0x1c2   :  { %v616_v12 = vadd.f32 %v615_v19, %v526_v63  ;;  %v744_v62 = vadd.f32 %v2435_v17, %v743_v20 }
 0x1c4   :  { %v637_v30 = vpack.c.bf16 %v616_v12, %v614_v27  ;;  %v742_v27 = vadd.f32 %v2435_v17, %v741_v6 }
 0x1c6   :  { %785 = vmatmul.bf16.gmra.mxu2 %v637_v30 }
 0x1c9   :  { %v618_v11 = vpop.f32.mrf.mxu1  ;;  %v746_v46 = vpop.f32.mrf.mxu2 }
 0x1ca   :  { %v619_v40 = vadd.f32 %v618_v11, %v529_v42  ;;  %v747_v52 = vadd.f32 %v2435_v17, %v746_v46  ;;  %v739_v42 = vadd.f32 %v2435_v17, %v738_v9  ;;  %v807_v11 = vmax.f32 %v744_v62, 0.0 }
 0x1cc   :  { %v808_v12 = vmax.f32 %v747_v52, 0.0  ;;  %v805_v46 = vmax.f32 %v739_v42, 0.0 }
 0x1d1   :  { %v620_v56 = vpop.f32.mrf.mxu1  ;;  %v748_v35 = vpop.f32.mrf.mxu2 }
 0x1d2   :  { %v621_v43 = vadd.f32 %v620_v56, %v531_v53  ;;  %v749_v5 = vadd.f32 %v2435_v17, %v748_v35  ;;  %v737_v56 = vadd.f32 %v2435_v17, %v736_v1  ;;  %v806_v35 = vmax.f32 %v742_v27, 0.0 }
 0x1d4   :  { %v638_v59 = vpack.c.bf16 %v621_v43, %v619_v40  ;;  %v809_v63 = vmax.f32 %v749_v5, 0.0  ;;  %v833_v40 = vpack.c.bf16 %v807_v11, %v806_v35  ;;  %v804_v43 = vmax.f32 %v737_v56, 0.0 }
 0x1d6   :  { %790 = vmatmul.bf16.gmra.mxu2 %v638_v59  ;;  %v834_v53 = vpack.c.bf16 %v809_v63, %v808_v12  ;;  %v832_v59 = vpack.c.bf16 %v805_v46, %v804_v43 }
 0x1d9   :  { %v751_v41 = vpop.f32.mrf.mxu2 }
 0x1da   :  { %v752_v61 = vadd.f32 %v2435_v17, %v751_v41 }
 0x1dc   :  { %v810_v3 = vmax.f32 %v752_v61, 0.0 }
 0x1e1   :  { %v753_v22 = vpop.f32.mrf.mxu2 }
 0x1e2   :  { %v754_v15 = vadd.f32 %v2435_v17, %v753_v22 }
 0x1e4   :  { %v811_v18 = vmax.f32 %v754_v15, 0.0 }
 0x1e6   :  { %v835_v19 = vpack.c.bf16 %v811_v18, %v810_v3 }
 0x1e8   :  { %844 = vmatpush.bf16.msrb.mxu3 %v835_v19 }
 0x1e9   :  { %v2457_v30 = vpop.f32.mrf.mxu2 }
 0x1ec   :  { %845 = vmatpush.bf16.msrb.mxu3 %v834_v53 }
 0x1f0   :  { %846 = vmatpush.bf16.msrb.mxu3 %v833_v40 }
 0x1f1   :  { %v2461_v20 = vpop.f32.mrf.mxu2 }
 0x1f4   :  { %847 = vmatpush.bf16.msrb.mxu3 %v832_v59 }
 0x1f8   :  { %848 = vmatpush.bf16.msrb.mxu3 %v831_v50 }
 0x1f9   :  { %v761_v6 = vpop.f32.mrf.mxu2 }
 0x1fc   :  { %849 = vmatpush.bf16.msrb.mxu3 %v2447_v34 }
 0x200   :  { %850 = vmatpush.bf16.msrb.mxu3 %v2443_v25 }
 0x201   :  { %v763_v9 = vpop.f32.mrf.mxu2 }
 0x204   :  { %851 = vmatpush.bf16.msrb.mxu3 %v2439_v37 }
 0x207   :  { %852 = vmatmul.bf16.vlgmr.msrb.gmra.mxu3 %v2326_v14 }
 0x209   :  { %v766_v1 = vpop.f32.mrf.mxu2 }
 0x211   :  { %v768_v41 = vpop.f32.mrf.mxu2 }
 0x217   :  { %857 = vmatmul.bf16.gmra.mxu3 %v2332_v24 }
 0x219   :  { %v771_v61 = vpop.f32.mrf.mxu2 }
 0x221   :  { %v773_v22 = vpop.f32.mrf.mxu2 }
 0x227   :  { %862 = vmatmul.bf16.gmra.mxu3 %v2338_v33 }
 0x229   :  { %v776_v5 = vpop.f32.mrf.mxu2 }
 0x22a   :  { %v777_v59 = vadd.f32 %v2435_v17, %v776_v5  ;;  %v764_v5 = vadd.f32 %v2435_v17, %v763_v9 }
 0x231   :  { %v778_v50 = vpop.f32.mrf.mxu2 }
 0x232   :  { %v779_v46 = vadd.f32 %v2435_v17, %v778_v50  ;;  %v767_v50 = vadd.f32 %v2435_v17, %v766_v1  ;;  %v757_v1 = vadd.f32 %v2435_v17, %v2457_v30  ;;  %v2007_v30 = vld [vmem:[#allocation8 + $0x30] sm:$0xff] }
 0x237   :  { %867 = vmatmul.bf16.gmra.mxu3 %v2344_v39 }
 0x239   :  { %v781_v34 = vpop.f32.mrf.mxu2 }
 0x23a   :  { %v782_v56 = vadd.f32 %v2435_v17, %v781_v34  ;;  %v769_v34 = vadd.f32 %v2435_v17, %v768_v41  ;;  %v815_v41 = vmax.f32 %v764_v5, 0.0 }
 0x241   :  { %v783_v15 = vpop.f32.mrf.mxu2 }
 0x242   :  { %v784_v42 = vadd.f32 %v2435_v17, %v783_v15 }
 0x244   :  { %v823_v40 = vmax.f32 %v784_v42, 0.0  ;;  %v816_v42 = vmax.f32 %v767_v50, 0.0 }
 0x247   :  { %872 = vmatmul.bf16.gmra.mxu3 %v2350_v45 }
 0x249   :  { %v786_v25 = vpop.f32.mrf.mxu2 }
 0x24a   :  { %v787_v19 = vadd.f32 %v2435_v17, %v786_v25  ;;  %v774_v25 = vadd.f32 %v2435_v17, %v773_v22  ;;  %v762_v22 = vadd.f32 %v2435_v17, %v761_v6 }
 0x24c   :  { %v824_v35 = vmax.f32 %v787_v19, 0.0 }
 0x251   :  { %v788_v37 = vpop.f32.mrf.mxu2 }
 0x252   :  { %v789_v62 = vadd.f32 %v2435_v17, %v788_v37  ;;  %v822_v37 = vmax.f32 %v782_v56, 0.0 }
 0x254   :  { %v825_v11 = vmax.f32 %v789_v62, 0.0  ;;  %v841_v15 = vpack.c.bf16 %v823_v40, %v822_v37  ;;  %v819_v62 = vmax.f32 %v774_v25, 0.0  ;;  %v2005_v40 = vld [vmem:[#allocation8 + $0x20] sm:$0xff]  ;;  %v2003_v37 = vld [vmem:[#allocation8 + $0x10] sm:$0xff]  ;;  %v2002_v25 = vld [vmem:[#allocation8 + $0x8] sm:$0xff] }
 0x256   :  { %v842_v43 = vpack.c.bf16 %v825_v11, %v824_v35  ;;  %v812_v35 = vmax.f32 %v757_v1, 0.0 }
 0x257   :  { %877 = vmatmul.bf16.gmra.mxu3 %v2324_v13 }
 0x259   :  { %v791_v52 = vpop.f32.mrf.mxu2 }
 0x25a   :  { %v792_v3 = vadd.f32 %v2435_v17, %v791_v52  ;;  %v821_v52 = vmax.f32 %v779_v46, 0.0 }
 0x25c   :  { %v826_v27 = vmax.f32 %v792_v3, 0.0  ;;  %v772_v3 = vadd.f32 %v2435_v17, %v771_v61  ;;  %v759_v61 = vadd.f32 %v2435_v17, %v2461_v20  ;;  %v2006_v20 = vld [vmem:[#allocation8 + $0x28] sm:$0xff] }
 0x25e   :  { %v818_v19 = vmax.f32 %v772_v3, 0.0  ;;  %v813_v56 = vmax.f32 %v759_v61, 0.0 }
 0x260   :  { %v836_v46 = vpack.c.bf16 %v813_v56, %v812_v35 }
 0x261   :  { %v793_v18 = vpop.f32.mrf.mxu2 }
 0x262   :  { %v794_v63 = vadd.f32 %v2435_v17, %v793_v18  ;;  %v820_v18 = vmax.f32 %v777_v59, 0.0  ;;  %v2008_v17 = vld [vmem:[#allocation8 + $0x38] sm:$0xff] }
 0x263   :  { %1106 = vmatpush.bf16.msra.mxu1 %v2008_v17 }
 0x264   :  { %v827_v12 = vmax.f32 %v794_v63, 0.0  ;;  %v840_v63 = vpack.c.bf16 %v821_v52, %v820_v18 }
 0x266   :  { %v843_v53 = vpack.c.bf16 %v827_v12, %v826_v27  ;;  %v817_v27 = vmax.f32 %v769_v34, 0.0  ;;  %v839_v12 = vpack.c.bf16 %v819_v62, %v818_v19 }
 0x267   :  { %882 = vmatmul.bf16.gmra.mxu3 %v2330_v23  ;;  %1107 = vmatpush.bf16.msra.mxu1 %v2007_v30 }
 0x268   :  { %933 = vmatpush.bf16.msrb.mxu0 %v843_v53  ;;  %v838_v11 = vpack.c.bf16 %v817_v27, %v816_v42  ;;  %v814_v53 = vmax.f32 %v762_v22, 0.0 }
 0x26a   :  { %v837_v9 = vpack.c.bf16 %v815_v41, %v814_v53 }
 0x26b   :  { %1108 = vmatpush.bf16.msra.mxu1 %v2006_v20 }
 0x26c   :  { %934 = vmatpush.bf16.msrb.mxu0 %v842_v43  ;;  %v2004_v43 = vld [vmem:[#allocation8 + $0x18] sm:$0xff] }
 0x26f   :  { %1109 = vmatpush.bf16.msra.mxu1 %v2005_v40 }
 0x270   :  { %935 = vmatpush.bf16.msrb.mxu0 %v841_v15  ;;  %v2001_v15 = vld [vmem:[#allocation8] sm:$0xff] }
 0x273   :  { %1110 = vmatpush.bf16.msra.mxu1 %v2004_v43 }
 0x274   :  { %936 = vmatpush.bf16.msrb.mxu0 %v840_v63 }
 0x277   :  { %887 = vmatmul.bf16.gmra.mxu3 %v2354_v48  ;;  %1111 = vmatpush.bf16.msra.mxu1 %v2003_v37 }
 0x278   :  { %937 = vmatpush.bf16.msrb.mxu0 %v839_v12 }
 0x27b   :  { %1112 = vmatpush.bf16.msra.mxu1 %v2002_v25 }
 0x27c   :  { %938 = vmatpush.bf16.msrb.mxu0 %v838_v11 }
 0x27f   :  { %1113 = vmatpush.bf16.msra.mxu1 %v2001_v15 }
 0x280   :  { %939 = vmatpush.bf16.msrb.mxu0 %v837_v9 }
 0x284   :  { %940 = vmatpush.bf16.msrb.mxu0 %v836_v46 }
 0x287   :  { %941 = vmatmul.bf16.vlgmr.msrb.gmra.mxu0 %v2336_v32  ;;  %892 = vmatmul.bf16.gmra.mxu3 %v2360_v54 }
 0x28a   :  { %v853_v6 = vpop.f32.mrf.mxu3 }
 0x292   :  { %v855_v59 = vpop.f32.mrf.mxu3 }
 0x297   :  { %946 = vmatmul.bf16.gmra.mxu0 %v2342_v38  ;;  %897 = vmatmul.bf16.gmra.mxu3 %v2366_v60 }
 0x29a   :  { %v858_v52 = vpop.f32.mrf.mxu3 }
 0x2a2   :  { %v860_v3 = vpop.f32.mrf.mxu3 }
 0x2a7   :  { %951 = vmatmul.bf16.gmra.mxu0 %v2348_v44  ;;  %902 = vmatmul.bf16.gmra.mxu3 %v2372_v4 }
 0x2aa   :  { %v863_v18 = vpop.f32.mrf.mxu3 }
 0x2b2   :  { %v865_v34 = vpop.f32.mrf.mxu3 }
 0x2b7   :  { %956 = vmatmul.bf16.gmra.mxu0 %v2357_v51  ;;  %907 = vmatmul.bf16.gmra.mxu3 %v2392_v36 }
 0x2ba   :  { %v868_v63 = vpop.f32.mrf.mxu3 }
 0x2c2   :  { %v870_v12 = vpop.f32.mrf.mxu3 }
 0x2c7   :  { %961 = vmatmul.bf16.gmra.mxu0 %v2363_v57  ;;  %912 = vmatmul.bf16.gmra.mxu3 %v2398_v55 }
 0x2ca   :  { %v873_v42 = vpop.f32.mrf.mxu3 }
 0x2d2   :  { %v875_v53 = vpop.f32.mrf.mxu3 }
 0x2d7   :  { %966 = vmatmul.bf16.gmra.mxu0 %v2369_v0  ;;  %917 = vmatmul.bf16.gmra.mxu3 %v2404_v8 }
 0x2da   :  { %v878_v9 = vpop.f32.mrf.mxu3 }
 0x2e7   :  { %971 = vmatmul.bf16.gmra.mxu0 %v2375_v10  ;;  %922 = vmatmul.bf16.gmra.mxu3 %v2410_v31 }
 0x2f7   :  { %976 = vmatmul.bf16.gmra.mxu0 %v2382_v21  ;;  %927 = vmatmul.bf16.gmra.mxu3 %v2416_v58 }
 0x304   :  { %v942_v62 = vpop.f32.mrf.mxu0 }
 0x305   :  { %v943_v19 = vadd.f32 %v942_v62, %v853_v6  ;;  %v880_v6 = vpop.f32.mrf.mxu3 }
 0x307   :  { %981 = vmatmul.bf16.gmra.mxu0 %v2389_v29 }
 0x30c   :  { %v944_v50 = vpop.f32.mrf.mxu0 }
 0x30d   :  { %v945_v5 = vadd.f32 %v944_v50, %v855_v59  ;;  %v883_v37 = vpop.f32.mrf.mxu3 }
 0x30f   :  { %v1022_v27 = vpack.c.bf16 %v945_v5, %v943_v19 }
 0x311   :  { %1114 = vmatmul.bf16.vlgmr.msra.gmra.mxu1 %v1022_v27 }
 0x314   :  { %v947_v22 = vpop.f32.mrf.mxu0 }
 0x315   :  { %v948_v41 = vadd.f32 %v947_v22, %v858_v52  ;;  %v885_v15 = vpop.f32.mrf.mxu3 }
 0x317   :  { %986 = vmatmul.bf16.gmra.mxu0 %v2395_v49 }
 0x31c   :  { %v949_v61 = vpop.f32.mrf.mxu0 }
 0x31d   :  { %v950_v11 = vadd.f32 %v949_v61, %v860_v3  ;;  %v888_v50 = vpop.f32.mrf.mxu3 }
 0x31f   :  { %v1023_v1 = vpack.c.bf16 %v950_v11, %v948_v41 }
 0x321   :  { %1119 = vmatmul.bf16.gmra.mxu1 %v1023_v1 }
 0x324   :  { %v952_v56 = vpop.f32.mrf.mxu0 }
 0x325   :  { %v953_v46 = vadd.f32 %v952_v56, %v863_v18  ;;  %v890_v27 = vpop.f32.mrf.mxu3 }
 0x327   :  { %991 = vmatmul.bf16.gmra.mxu0 %v2401_v2 }
 0x32c   :  { %v954_v35 = vpop.f32.mrf.mxu0 }
 0x32d   :  { %v955_v17 = vadd.f32 %v954_v35, %v865_v34  ;;  %v893_v41 = vpop.f32.mrf.mxu3 }
 0x32f   :  { %v1024_v30 = vpack.c.bf16 %v955_v17, %v953_v46 }
 0x331   :  { %1124 = vmatmul.bf16.gmra.mxu1 %v1024_v30 }
 0x334   :  { %v957_v20 = vpop.f32.mrf.mxu0 }
 0x335   :  { %v958_v43 = vadd.f32 %v957_v20, %v868_v63  ;;  %v895_v56 = vpop.f32.mrf.mxu3 }
 0x337   :  { %996 = vmatmul.bf16.gmra.mxu0 %v2407_v26 }
 0x33c   :  { %v959_v40 = vpop.f32.mrf.mxu0 }
 0x33d   :  { %v960_v59 = vadd.f32 %v959_v40, %v870_v12  ;;  %v898_v46 = vpop.f32.mrf.mxu3 }
 0x33f   :  { %v1025_v25 = vpack.c.bf16 %v960_v59, %v958_v43 }
 0x341   :  { %1129 = vmatmul.bf16.gmra.mxu1 %v1025_v25 }
 0x344   :  { %v962_v52 = vpop.f32.mrf.mxu0 }
 0x345   :  { %v963_v62 = vadd.f32 %v962_v52, %v873_v42  ;;  %v900_v40 = vpop.f32.mrf.mxu3 }
 0x347   :  { %1001 = vmatmul.bf16.gmra.mxu0 %v2413_v47 }
 0x34c   :  { %v964_v3 = vpop.f32.mrf.mxu0 }
 0x34d   :  { %v965_v18 = vadd.f32 %v964_v3, %v875_v53  ;;  %v2519_v3 = vld [vmem:[%s2669_s5] ss:$0 sm:$0xff] }
 0x34f   :  { %v1026_v34 = vpack.c.bf16 %v965_v18, %v963_v62 }
 0x351   :  { %1134 = vmatmul.bf16.gmra.mxu1 %v1026_v34 }
 0x354   :  { %v967_v19 = vpop.f32.mrf.mxu0 }
 0x355   :  { %v968_v63 = vadd.f32 %v967_v19, %v878_v9 }
 0x357   :  { %1006 = vmatmul.bf16.gmra.mxu0 %v2419_v7 }
 0x35c   :  { %v969_v5 = vpop.f32.mrf.mxu0 }
 0x35d   :  { %v970_v12 = vadd.f32 %v969_v5, %v880_v6 }
 0x35f   :  { %v1027_v22 = vpack.c.bf16 %v970_v12, %v968_v63 }
 0x361   :  { %1139 = vmatmul.bf16.gmra.mxu1 %v1027_v22 }
 0x364   :  { %v972_v61 = vpop.f32.mrf.mxu0 }
 0x365   :  { %v973_v1 = vadd.f32 %v972_v61, %v883_v37  ;;  %v903_v37 = vpop.f32.mrf.mxu3 }
 0x367   :  { %1011 = vmatmul.bf16.gmra.mxu0 %v2424_v28 }
 0x36c   :  { %v974_v11 = vpop.f32.mrf.mxu0 }
 0x36d   :  { %v975_v42 = vadd.f32 %v974_v11, %v885_v15  ;;  %v905_v19 = vpop.f32.mrf.mxu3 }
 0x36f   :  { %v1028_v53 = vpack.c.bf16 %v975_v42, %v973_v1 }
 0x371   :  { %1144 = vmatmul.bf16.gmra.mxu1 %v1028_v53 }
 0x374   :  { %v977_v35 = vpop.f32.mrf.mxu0 }
 0x375   :  { %v978_v30 = vadd.f32 %v977_v35, %v888_v50  ;;  %v908_v1 = vpop.f32.mrf.mxu3 }
 0x377   :  { %1016 = vmatmul.bf16.gmra.mxu0 %v2429_v16 }
 0x37c   :  { %v979_v17 = vpop.f32.mrf.mxu0 }
 0x37d   :  { %v980_v9 = vadd.f32 %v979_v17, %v890_v27 }
 0x37f   :  { %v1029_v20 = vpack.c.bf16 %v980_v9, %v978_v30 }
 0x381   :  { %1149 = vmatmul.bf16.gmra.mxu1 %v1029_v20 }
 0x384   :  { %v982_v6 = vpop.f32.mrf.mxu0 }
 0x385   :  { %v983_v59 = vadd.f32 %v982_v6, %v893_v41  ;;  %v910_v6 = vpop.f32.mrf.mxu3 }
 0x38c   :  { %v984_v43 = vpop.f32.mrf.mxu0 }
 0x38d   :  { %v985_v25 = vadd.f32 %v984_v43, %v895_v56 }
 0x38e   :  { %v1115_v52 = vpop.f32.mrf.mxu1 }
 0x38f   :  { %v1030_v15 = vpack.c.bf16 %v985_v25, %v983_v59  ;;  %v1116_v18 = vadd.f32 %v2519_v3, %v1115_v52 }
 0x391   :  { %1154 = vmatmul.bf16.gmra.mxu1 %v1030_v15  ;;  %v1195_v5 = vmax.f32 %v1116_v18, 0.0 }
 0x394   :  { %v987_v62 = vpop.f32.mrf.mxu0 }
 0x395   :  { %v988_v22 = vadd.f32 %v987_v62, %v898_v46  ;;  %v913_v62 = vpop.f32.mrf.mxu3 }
 0x396   :  { %v1117_v34 = vpop.f32.mrf.mxu1 }
 0x397   :  { %v1118_v50 = vadd.f32 %v2519_v3, %v1117_v34 }
 0x399   :  { %v1196_v27 = vmax.f32 %v1118_v50, 0.0 }
 0x39b   :  { %v2523_v63 = vpack.c.bf16 %v1196_v27, %v1195_v5 }
 0x39c   :  { %v989_v12 = vpop.f32.mrf.mxu0 }
 0x39d   :  { %v990_v61 = vadd.f32 %v989_v12, %v900_v40 }
 0x39e   :  { %v1120_v41 = vpop.f32.mrf.mxu1 }
 0x39f   :  { %v1031_v11 = vpack.c.bf16 %v990_v61, %v988_v22  ;;  %v1121_v53 = vadd.f32 %v2519_v3, %v1120_v41 }
 0x3a1   :  { %1159 = vmatmul.bf16.gmra.mxu1 %v1031_v11  ;;  %v1197_v17 = vmax.f32 %v1121_v53, 0.0 }
 0x3a4   :  { %v992_v42 = vpop.f32.mrf.mxu0 }
 0x3a5   :  { %v993_v43 = vadd.f32 %v992_v42, %v903_v37 }
 0x3a6   :  { %v1122_v56 = vpop.f32.mrf.mxu1 }
 0x3a7   :  { %v1123_v35 = vadd.f32 %v2519_v3, %v1122_v56 }
 0x3a9   :  { %v1198_v30 = vmax.f32 %v1123_v35, 0.0 }
 0x3ab   :  { %v2527_v9 = vpack.c.bf16 %v1198_v30, %v1197_v17 }
 0x3ac   :  { %v994_v20 = vpop.f32.mrf.mxu0 }
 0x3ad   :  { %v995_v59 = vadd.f32 %v994_v20, %v905_v19  ;;  %v915_v19 = vpop.f32.mrf.mxu3 }
 0x3ae   :  { %v1125_v46 = vpop.f32.mrf.mxu1 }
 0x3af   :  { %v1032_v40 = vpack.c.bf16 %v995_v59, %v993_v43  ;;  %v1126_v52 = vadd.f32 %v2519_v3, %v1125_v46 }
 0x3b1   :  { %1164 = vmatmul.bf16.gmra.mxu1 %v1032_v40  ;;  %v1199_v34 = vmax.f32 %v1126_v52, 0.0 }
 0x3b4   :  { %v997_v25 = vpop.f32.mrf.mxu0 }
 0x3b5   :  { %v998_v12 = vadd.f32 %v997_v25, %v908_v1  ;;  %v918_v17 = vpop.f32.mrf.mxu3 }
 0x3b6   :  { %v1127_v15 = vpop.f32.mrf.mxu1 }
 0x3b7   :  { %v1128_v18 = vadd.f32 %v2519_v3, %v1127_v15 }
 0x3b9   :  { %v1200_v50 = vmax.f32 %v1128_v18, 0.0 }
 0x3bb   :  { %v2531_v5 = vpack.c.bf16 %v1200_v50, %v1199_v34 }
 0x3bc   :  { %v999_v27 = vpop.f32.mrf.mxu0 }
 0x3bd   :  { %v1000_v22 = vadd.f32 %v999_v27, %v910_v6  ;;  %v920_v46 = vpop.f32.mrf.mxu3 }
 0x3be   :  { %v1130_v61 = vpop.f32.mrf.mxu1 }
 0x3bf   :  { %v1033_v37 = vpack.c.bf16 %v1000_v22, %v998_v12  ;;  %v1131_v11 = vadd.f32 %v2519_v3, %v1130_v61 }
 0x3c1   :  { %1169 = vmatmul.bf16.gmra.mxu1 %v1033_v37  ;;  %v1201_v56 = vmax.f32 %v1131_v11, 0.0 }
 0x3c4   :  { %v1002_v41 = vpop.f32.mrf.mxu0 }
 0x3c5   :  { %v1003_v43 = vadd.f32 %v1002_v41, %v913_v62  ;;  %v923_v34 = vpop.f32.mrf.mxu3 }
 0x3c6   :  { %v1132_v42 = vpop.f32.mrf.mxu1 }
 0x3c7   :  { %v1133_v53 = vadd.f32 %v2519_v3, %v1132_v42 }
 0x3c9   :  { %v1202_v35 = vmax.f32 %v1133_v53, 0.0 }
 0x3cb   :  { %v2535_v30 = vpack.c.bf16 %v1202_v35, %v1201_v56 }
 0x3cc   :  { %v1004_v20 = vpop.f32.mrf.mxu0 }
 0x3cd   :  { %v1005_v59 = vadd.f32 %v1004_v20, %v915_v19  ;;  %v925_v61 = vpop.f32.mrf.mxu3 }
 0x3ce   :  { %v1135_v1 = vpop.f32.mrf.mxu1 }
 0x3cf   :  { %v1034_v6 = vpack.c.bf16 %v1005_v59, %v1003_v43 }
 0x3d1   :  { %1174 = vmatmul.bf16.gmra.mxu1 %v1034_v6 }
 0x3d4   :  { %v1007_v40 = vpop.f32.mrf.mxu0 }
 0x3d5   :  { %v1008_v15 = vadd.f32 %v1007_v40, %v918_v17  ;;  %v928_v42 = vpop.f32.mrf.mxu3 }
 0x3d6   :  { %v1137_v25 = vpop.f32.mrf.mxu1 }
 0x3dc   :  { %v1009_v52 = vpop.f32.mrf.mxu0 }
 0x3dd   :  { %v1010_v18 = vadd.f32 %v1009_v52, %v920_v46  ;;  %v930_v35 = vpop.f32.mrf.mxu3 }
 0x3de   :  { %v1140_v50 = vpop.f32.mrf.mxu1 }
 0x3df   :  { %v1035_v27 = vpack.c.bf16 %v1010_v18, %v1008_v15 }
 0x3e1   :  { %1179 = vmatmul.bf16.gmra.mxu1 %v1035_v27 }
 0x3e4   :  { %v1012_v12 = vpop.f32.mrf.mxu0 }
 0x3e5   :  { %v1013_v11 = vadd.f32 %v1012_v12, %v923_v34 }
 0x3e6   :  { %v1142_v22 = vpop.f32.mrf.mxu1 }
 0x3e7   :  { %v1143_v12 = vadd.f32 %v2519_v3, %v1142_v22 }
 0x3ec   :  { %v1014_v37 = vpop.f32.mrf.mxu0 }
 0x3ed   :  { %v1015_v62 = vadd.f32 %v1014_v37, %v925_v61 }
 0x3ee   :  { %v1145_v19 = vpop.f32.mrf.mxu1 }
 0x3ef   :  { %v1036_v41 = vpack.c.bf16 %v1015_v62, %v1013_v11  ;;  %v1146_v18 = vadd.f32 %v2519_v3, %v1145_v19  ;;  %v1141_v11 = vadd.f32 %v2519_v3, %v1140_v50 }
 0x3f1   :  { %1184 = vmatmul.bf16.gmra.mxu1 %v1036_v41  ;;  %v1207_v62 = vmax.f32 %v1146_v18, 0.0 }
 0x3f4   :  { %v1017_v53 = vpop.f32.mrf.mxu0 }
 0x3f5   :  { %v1018_v17 = vadd.f32 %v1017_v53, %v928_v42  ;;  %v1138_v42 = vadd.f32 %v2519_v3, %v1137_v25  ;;  %v1206_v53 = vmax.f32 %v1143_v12, 0.0 }
 0x3f6   :  { %v1147_v56 = vpop.f32.mrf.mxu1 }
 0x3f7   :  { %v1148_v52 = vadd.f32 %v2519_v3, %v1147_v56  ;;  %v1136_v56 = vadd.f32 %v2519_v3, %v1135_v1  ;;  %v1204_v19 = vmax.f32 %v1138_v42, 0.0 }
 0x3f9   :  { %v1208_v61 = vmax.f32 %v1148_v52, 0.0 }
 0x3fc   :  { %v1019_v20 = vpop.f32.mrf.mxu0 }
 0x3fd   :  { %v1020_v43 = vadd.f32 %v1019_v20, %v930_v35  ;;  %v1233_v35 = vpack.c.bf16 %v1208_v61, %v1207_v62  ;;  %v1205_v20 = vmax.f32 %v1141_v11, 0.0 }
 0x3fe   :  { %v1150_v59 = vpop.f32.mrf.mxu1 }
 0x3ff   :  { %v1037_v6 = vpack.c.bf16 %v1020_v43, %v1018_v17  ;;  %v1151_v46 = vadd.f32 %v2519_v3, %v1150_v59  ;;  %v1232_v17 = vpack.c.bf16 %v1206_v53, %v1205_v20  ;;  %v1203_v43 = vmax.f32 %v1136_v56, 0.0 }
 0x401   :  { %1189 = vmatmul.bf16.gmra.mxu1 %v1037_v6  ;;  %v1209_v34 = vmax.f32 %v1151_v46, 0.0  ;;  %v1231_v6 = vpack.c.bf16 %v1204_v19, %v1203_v43 }
 0x406   :  { %v1152_v40 = vpop.f32.mrf.mxu1 }
 0x407   :  { %v1153_v15 = vadd.f32 %v2519_v3, %v1152_v40 }
 0x409   :  { %v1210_v27 = vmax.f32 %v1153_v15, 0.0 }
 0x40b   :  { %v1234_v37 = vpack.c.bf16 %v1210_v27, %v1209_v34 }
 0x40d   :  { %1243 = vmatpush.bf16.msra.mxu2 %v1234_v37 }
 0x40e   :  { %v1155_v41 = vpop.f32.mrf.mxu1 }
 0x40f   :  { %v1156_v22 = vadd.f32 %v2519_v3, %v1155_v41 }
 0x411   :  { %1244 = vmatpush.bf16.msra.mxu2 %v1233_v35  ;;  %v1211_v46 = vmax.f32 %v1156_v22, 0.0 }
 0x415   :  { %1245 = vmatpush.bf16.msra.mxu2 %v1232_v17 }
 0x416   :  { %v1157_v59 = vpop.f32.mrf.mxu1 }
 0x417   :  { %v1158_v50 = vadd.f32 %v2519_v3, %v1157_v59 }
 0x419   :  { %v1212_v40 = vmax.f32 %v1158_v50, 0.0  ;;  %1246 = vmatpush.bf16.msra.mxu2 %v1231_v6 }
 0x41b   :  { %v2547_v25 = vpack.c.bf16 %v1212_v40, %v1211_v46 }
 0x41d   :  { %1247 = vmatpush.bf16.msra.mxu2 %v2535_v30 }
 0x41e   :  { %v1160_v1 = vpop.f32.mrf.mxu1 }
 0x41f   :  { %v1161_v52 = vadd.f32 %v2519_v3, %v1160_v1 }
 0x421   :  { %1248 = vmatpush.bf16.msra.mxu2 %v2531_v5  ;;  %v1213_v34 = vmax.f32 %v1161_v52, 0.0 }
 0x425   :  { %1249 = vmatpush.bf16.msra.mxu2 %v2527_v9 }
 0x426   :  { %v1162_v15 = vpop.f32.mrf.mxu1 }
 0x427   :  { %v1163_v18 = vadd.f32 %v2519_v3, %v1162_v15 }
 0x429   :  { %v1214_v27 = vmax.f32 %v1163_v18, 0.0  ;;  %1250 = vmatpush.bf16.msra.mxu2 %v2523_v63 }
 0x42b   :  { %v1236_v12 = vpack.c.bf16 %v1214_v27, %v1213_v34 }
 0x42c   :  { %1251 = vmatmul.bf16.vlgmr.msra.gmra.mxu2 %v2326_v14 }
 0x42e   :  { %v1165_v61 = vpop.f32.mrf.mxu1 }
 0x42f   :  { %v1166_v30 = vadd.f32 %v2519_v3, %v1165_v61 }
 0x431   :  { %v1215_v11 = vmax.f32 %v1166_v30, 0.0 }
 0x436   :  { %v1167_v37 = vpop.f32.mrf.mxu1 }
 0x437   :  { %v1168_v5 = vadd.f32 %v2519_v3, %v1167_v37 }
 0x439   :  { %v1216_v62 = vmax.f32 %v1168_v5, 0.0 }
 0x43b   :  { %v1237_v41 = vpack.c.bf16 %v1216_v62, %v1215_v11 }
 0x43c   :  { %1256 = vmatmul.bf16.gmra.mxu2 %v2332_v24 }
 0x43e   :  { %v1170_v9 = vpop.f32.mrf.mxu1 }
 0x43f   :  { %v1171_v42 = vadd.f32 %v2519_v3, %v1170_v9 }
 0x441   :  { %v1217_v35 = vmax.f32 %v1171_v42, 0.0 }
 0x446   :  { %v1172_v53 = vpop.f32.mrf.mxu1 }
 0x447   :  { %v1173_v63 = vadd.f32 %v2519_v3, %v1172_v53 }
 0x449   :  { %v1218_v56 = vmax.f32 %v1173_v63, 0.0 }
 0x44b   :  { %v1238_v14 = vpack.c.bf16 %v1218_v56, %v1217_v35 }
 0x44c   :  { %1261 = vmatmul.bf16.gmra.mxu2 %v2338_v33 }
 0x44e   :  { %v1175_v20 = vpop.f32.mrf.mxu1 }
 0x44f   :  { %v1176_v30 = vadd.f32 %v2519_v3, %v1175_v20 }
 0x451   :  { %v1219_v62 = vmax.f32 %v1176_v30, 0.0 }
 0x456   :  { %v1177_v19 = vpop.f32.mrf.mxu1 }
 0x457   :  { %v1178_v34 = vadd.f32 %v2519_v3, %v1177_v19 }
 0x459   :  { %v1220_v5 = vmax.f32 %v1178_v34, 0.0 }
 0x45b   :  { %v1239_v9 = vpack.c.bf16 %v1220_v5, %v1219_v62 }
 0x45c   :  { %1266 = vmatmul.bf16.gmra.mxu2 %v2344_v39 }
 0x45e   :  { %v1180_v17 = vpop.f32.mrf.mxu1 }
 0x466   :  { %v1182_v43 = vpop.f32.mrf.mxu1 }
 0x467   :  { %v1183_v52 = vadd.f32 %v2519_v3, %v1182_v43 }
 0x469   :  { %v1222_v27 = vmax.f32 %v1183_v52, 0.0 }
 0x46c   :  { %1271 = vmatmul.bf16.gmra.mxu2 %v2350_v45 }
 0x46e   :  { %v1185_v24 = vpop.f32.mrf.mxu1 }
 0x46f   :  { %v1186_v40 = vadd.f32 %v2519_v3, %v1185_v24 }
 0x471   :  { %v1223_v18 = vmax.f32 %v1186_v40, 0.0 }
 0x476   :  { %v1187_v22 = vpop.f32.mrf.mxu1 }
 0x477   :  { %v1188_v46 = vadd.f32 %v2519_v3, %v1187_v22 }
 0x479   :  { %v1224_v15 = vmax.f32 %v1188_v46, 0.0 }
 0x47b   :  { %v1241_v61 = vpack.c.bf16 %v1224_v15, %v1223_v18 }
 0x47c   :  { %1276 = vmatmul.bf16.gmra.mxu2 %v2324_v13  ;;  %v1181_v13 = vadd.f32 %v2519_v3, %v1180_v17 }
 0x47e   :  { %v1190_v59 = vpop.f32.mrf.mxu1  ;;  %v1221_v37 = vmax.f32 %v1181_v13, 0.0 }
 0x47f   :  { %v1191_v6 = vadd.f32 %v2519_v3, %v1190_v59 }
 0x480   :  { %v1240_v11 = vpack.c.bf16 %v1222_v27, %v1221_v37 }
 0x481   :  { %v1225_v1 = vmax.f32 %v1191_v6, 0.0 }
 0x486   :  { %v1192_v50 = vpop.f32.mrf.mxu1 }
 0x487   :  { %v1193_v33 = vadd.f32 %v2519_v3, %v1192_v50 }
 0x489   :  { %v1226_v39 = vmax.f32 %v1193_v33, 0.0 }
 0x48b   :  { %v1242_v45 = vpack.c.bf16 %v1226_v39, %v1225_v1 }
 0x48c   :  { %1281 = vmatmul.bf16.gmra.mxu2 %v2330_v23  ;;  %v2016_v23 = vld [vmem:[#allocation10 + $0x38] sm:$0xff] }
 0x48d   :  { %1332 = vmatpush.bf16.msra.mxu3 %v1242_v45  ;;  %1505 = vmatpush.bf16.msra.mxu0 %v2016_v23 }
 0x491   :  { %1333 = vmatpush.bf16.msra.mxu3 %v1241_v61 }
 0x495   :  { %1334 = vmatpush.bf16.msra.mxu3 %v1240_v11 }
 0x499   :  { %1335 = vmatpush.bf16.msra.mxu3 %v1239_v9 }
 0x49c   :  { %1286 = vmatmul.bf16.gmra.mxu2 %v2354_v48  ;;  %v2014_v48 = vld [vmem:[#allocation10 + $0x28] sm:$0xff] }
 0x49d   :  { %1336 = vmatpush.bf16.msra.mxu3 %v1238_v14 }
 0x4a1   :  { %1337 = vmatpush.bf16.msra.mxu3 %v1237_v41 }
 0x4a5   :  { %1338 = vmatpush.bf16.msra.mxu3 %v1236_v12 }
 0x4a9   :  { %1339 = vmatpush.bf16.msra.mxu3 %v2547_v25 }
 0x4ac   :  { %1340 = vmatmul.bf16.vlgmr.msra.gmra.mxu3 %v2336_v32  ;;  %1291 = vmatmul.bf16.gmra.mxu2 %v2360_v54  ;;  %v2015_v32 = vld [vmem:[#allocation10 + $0x30] sm:$0xff]  ;;  %v2013_v54 = vld [vmem:[#allocation10 + $0x20] sm:$0xff] }
 0x4ad   :  { %1506 = vmatpush.bf16.msra.mxu0 %v2015_v32 }
 0x4b1   :  { %1507 = vmatpush.bf16.msra.mxu0 %v2014_v48 }
 0x4b5   :  { %1508 = vmatpush.bf16.msra.mxu0 %v2013_v54 }
 0x4bc   :  { %1345 = vmatmul.bf16.gmra.mxu3 %v2342_v38  ;;  %1296 = vmatmul.bf16.gmra.mxu2 %v2366_v60  ;;  %v1252_v38 = vpop.f32.mrf.mxu2 }
 0x4c4   :  { %v1254_v60 = vpop.f32.mrf.mxu2 }
 0x4cc   :  { %1350 = vmatmul.bf16.gmra.mxu3 %v2348_v44  ;;  %1301 = vmatmul.bf16.gmra.mxu2 %v2372_v4  ;;  %v2012_v44 = vld [vmem:[#allocation10 + $0x18] sm:$0xff]  ;;  %v1257_v4 = vpop.f32.mrf.mxu2 }
 0x4cd   :  { %1509 = vmatpush.bf16.msra.mxu0 %v2012_v44 }
 0x4dc   :  { %1355 = vmatmul.bf16.gmra.mxu3 %v2357_v51  ;;  %1306 = vmatmul.bf16.gmra.mxu2 %v2392_v36  ;;  %v2011_v51 = vld [vmem:[#allocation10 + $0x10] sm:$0xff]  ;;  %v1259_v36 = vpop.f32.mrf.mxu2 }
 0x4dd   :  { %1510 = vmatpush.bf16.msra.mxu0 %v2011_v51 }
 0x4e4   :  { %v1262_v3 = vpop.f32.mrf.mxu2 }
 0x4ec   :  { %1360 = vmatmul.bf16.gmra.mxu3 %v2363_v57  ;;  %1311 = vmatmul.bf16.gmra.mxu2 %v2398_v55  ;;  %v2010_v57 = vld [vmem:[#allocation10 + $0x8] sm:$0xff] }
 0x4ed   :  { %1511 = vmatpush.bf16.msra.mxu0 %v2010_v57 }
 0x4fc   :  { %1365 = vmatmul.bf16.gmra.mxu3 %v2369_v0  ;;  %v2009_v0 = vld [vmem:[#allocation10] sm:$0xff]  ;;  %1316 = vmatmul.bf16.gmra.mxu2 %v2404_v8 }
 0x4fd   :  { %1512 = vmatpush.bf16.msra.mxu0 %v2009_v0 }
 0x50c   :  { %1370 = vmatmul.bf16.gmra.mxu3 %v2375_v10  ;;  %v1264_v10 = vpop.f32.mrf.mxu2  ;;  %1321 = vmatmul.bf16.gmra.mxu2 %v2410_v31 }
 0x514   :  { %v1267_v25 = vpop.f32.mrf.mxu2 }
 0x51c   :  { %1375 = vmatmul.bf16.gmra.mxu3 %v2382_v21  ;;  %v1269_v63 = vpop.f32.mrf.mxu2  ;;  %1326 = vmatmul.bf16.gmra.mxu2 %v2416_v58 }
 0x524   :  { %v1272_v8 = vpop.f32.mrf.mxu2 }
 0x52c   :  { %1380 = vmatmul.bf16.gmra.mxu3 %v2389_v29  ;;  %v1274_v31 = vpop.f32.mrf.mxu2 }
 0x52f   :  { %v1341_v55 = vpop.f32.mrf.mxu3 }
 0x530   :  { %v1342_v41 = vadd.f32 %v1341_v55, %v1252_v38 }
 0x534   :  { %v1277_v19 = vpop.f32.mrf.mxu2 }
 0x537   :  { %v1343_v12 = vpop.f32.mrf.mxu3 }
 0x538   :  { %v1344_v42 = vadd.f32 %v1343_v12, %v1254_v60 }
 0x53a   :  { %v1421_v53 = vpack.c.bf16 %v1344_v42, %v1342_v41 }
 0x53c   :  { %1385 = vmatmul.bf16.gmra.mxu3 %v2395_v49  ;;  %1513 = vmatmul.bf16.vlgmr.msra.gmra.mxu0 %v1421_v53  ;;  %v1279_v22 = vpop.f32.mrf.mxu2 }
 0x53f   :  { %v1346_v21 = vpop.f32.mrf.mxu3 }
 0x540   :  { %v1347_v56 = vadd.f32 %v1346_v21, %v1257_v4 }
 0x544   :  { %v1282_v46 = vpop.f32.mrf.mxu2 }
 0x547   :  { %v1348_v35 = vpop.f32.mrf.mxu3 }
 0x548   :  { %v1349_v29 = vadd.f32 %v1348_v35, %v1259_v36 }
 0x54a   :  { %v1422_v14 = vpack.c.bf16 %v1349_v29, %v1347_v56 }
 0x54c   :  { %1390 = vmatmul.bf16.gmra.mxu3 %v2401_v2  ;;  %1518 = vmatmul.bf16.gmra.mxu0 %v1422_v14  ;;  %v1284_v40 = vpop.f32.mrf.mxu2 }
 0x54f   :  { %v1351_v20 = vpop.f32.mrf.mxu3 }
 0x550   :  { %v1352_v43 = vadd.f32 %v1351_v20, %v1262_v3 }
 0x557   :  { %v1353_v17 = vpop.f32.mrf.mxu3 }
 0x558   :  { %v1354_v24 = vadd.f32 %v1353_v17, %v1264_v10 }
 0x55a   :  { %v1423_v49 = vpack.c.bf16 %v1354_v24, %v1352_v43 }
 0x55c   :  { %1395 = vmatmul.bf16.gmra.mxu3 %v2407_v26  ;;  %1523 = vmatmul.bf16.gmra.mxu0 %v1423_v49  ;;  %v1287_v26 = vpop.f32.mrf.mxu2 }
 0x55f   :  { %v1356_v58 = vpop.f32.mrf.mxu3 }
 0x560   :  { %v1357_v6 = vadd.f32 %v1356_v58, %v1267_v25 }
 0x564   :  { %v1289_v18 = vpop.f32.mrf.mxu2 }
 0x567   :  { %v1358_v59 = vpop.f32.mrf.mxu3 }
 0x568   :  { %v1359_v50 = vadd.f32 %v1358_v59, %v1269_v63 }
 0x56a   :  { %v1424_v33 = vpack.c.bf16 %v1359_v50, %v1357_v6 }
 0x56c   :  { %1400 = vmatmul.bf16.gmra.mxu3 %v2413_v47  ;;  %1528 = vmatmul.bf16.gmra.mxu0 %v1424_v33  ;;  %v1292_v30 = vpop.f32.mrf.mxu2 }
 0x56f   :  { %v1361_v2 = vpop.f32.mrf.mxu3 }
 0x570   :  { %v1362_v39 = vadd.f32 %v1361_v2, %v1272_v8 }
 0x574   :  { %v1294_v9 = vpop.f32.mrf.mxu2 }
 0x577   :  { %v1363_v1 = vpop.f32.mrf.mxu3 }
 0x578   :  { %v1364_v52 = vadd.f32 %v1363_v1, %v1274_v31 }
 0x57a   :  { %v1425_v15 = vpack.c.bf16 %v1364_v52, %v1362_v39 }
 0x57c   :  { %1405 = vmatmul.bf16.gmra.mxu3 %v2419_v7  ;;  %1533 = vmatmul.bf16.gmra.mxu0 %v1425_v15  ;;  %v1297_v23 = vpop.f32.mrf.mxu2 }
 0x57f   :  { %v1366_v45 = vpop.f32.mrf.mxu3 }
 0x580   :  { %v1367_v34 = vadd.f32 %v1366_v45, %v1277_v19 }
 0x587   :  { %v1368_v13 = vpop.f32.mrf.mxu3 }
 0x588   :  { %v1369_v27 = vadd.f32 %v1368_v13, %v1279_v22 }
 0x58a   :  { %v1426_v61 = vpack.c.bf16 %v1369_v27, %v1367_v34 }
 0x58c   :  { %1410 = vmatmul.bf16.gmra.mxu3 %v2424_v28  ;;  %1538 = vmatmul.bf16.gmra.mxu0 %v1426_v61  ;;  %v1299_v28 = vpop.f32.mrf.mxu2 }
 0x58f   :  { %v1371_v47 = vpop.f32.mrf.mxu3 }
 0x590   :  { %v1372_v5 = vadd.f32 %v1371_v47, %v1282_v46 }
 0x594   :  { %v1302_v0 = vpop.f32.mrf.mxu2 }
 0x597   :  { %v1373_v37 = vpop.f32.mrf.mxu3 }
 0x598   :  { %v1374_v11 = vadd.f32 %v1373_v37, %v1284_v40 }
 0x59a   :  { %v1427_v62 = vpack.c.bf16 %v1374_v11, %v1372_v5 }
 0x59c   :  { %1415 = vmatmul.bf16.gmra.mxu3 %v2429_v16  ;;  %1543 = vmatmul.bf16.gmra.mxu0 %v1427_v62  ;;  %v1304_v10 = vpop.f32.mrf.mxu2 }
 0x59f   :  { %v1376_v7 = vpop.f32.mrf.mxu3 }
 0x5a0   :  { %v1377_v48 = vadd.f32 %v1376_v7, %v1287_v26 }
 0x5a4   :  { %v1307_v53 = vpop.f32.mrf.mxu2 }
 0x5a7   :  { %v1378_v32 = vpop.f32.mrf.mxu3 }
 0x5a8   :  { %v1379_v38 = vadd.f32 %v1378_v32, %v1289_v18 }
 0x5aa   :  { %v1428_v54 = vpack.c.bf16 %v1379_v38, %v1377_v48 }
 0x5ac   :  { %1548 = vmatmul.bf16.gmra.mxu0 %v1428_v54  ;;  %v1309_v35 = vpop.f32.mrf.mxu2 }
 0x5af   :  { %v1381_v44 = vpop.f32.mrf.mxu3 }
 0x5b0   :  { %v1382_v51 = vadd.f32 %v1381_v44, %v1292_v30 }
 0x5b4   :  { %v1312_v17 = vpop.f32.mrf.mxu2 }
 0x5b7   :  { %v1383_v60 = vpop.f32.mrf.mxu3 }
 0x5b8   :  { %v1384_v57 = vadd.f32 %v1383_v60, %v1294_v9 }
 0x5b9   :  { %v2600_v4 = vpop.f32.mrf.mxu0 }
 0x5ba   :  { %v1429_v36 = vpack.c.bf16 %v1384_v57, %v1382_v51  ;;  %v2617_v57 = vld [vmem:[%s2671_s7] ss:$0 sm:$0xff]  ;;  %s2243_s7 = smov [#allocation13]  }
 0x5bb   :  { %s1642_s20 = sshll.u32 %s2243_s7, 4  ;;  %s1643_s20 = int_to_ptr.vmem [resolvable:$true] %s1642_s20 }
 0x5bc   :  { %1553 = vmatmul.bf16.gmra.mxu0 %v1429_v36  ;;  %v1314_v59 = vpop.f32.mrf.mxu2 }
 0x5bf   :  { %v1386_v3 = vpop.f32.mrf.mxu3 }
 0x5c0   :  { %v1387_v25 = vadd.f32 %v1386_v3, %v1297_v23 }
 0x5c1   :  { %v2602_v16 = vpop.f32.mrf.mxu0 }
 0x5c4   :  { %v1317_v46 = vpop.f32.mrf.mxu2 }
 0x5c7   :  { %v1388_v55 = vpop.f32.mrf.mxu3 }
 0x5c8   :  { %v1389_v12 = vadd.f32 %v1388_v55, %v1299_v28 }
 0x5c9   :  { %v2604_v41 = vpop.f32.mrf.mxu0 }
 0x5ca   :  { %v1430_v42 = vpack.c.bf16 %v1389_v12, %v1387_v25 }
 0x5cc   :  { %1558 = vmatmul.bf16.gmra.mxu0 %v1430_v42  ;;  %v1319_v52 = vpop.f32.mrf.mxu2 }
 0x5cf   :  { %v1391_v63 = vpop.f32.mrf.mxu3 }
 0x5d0   :  { %v1392_v56 = vadd.f32 %v1391_v63, %v1302_v0 }
 0x5d1   :  { %v2606_v21 = vpop.f32.mrf.mxu0 }
 0x5d4   :  { %v1322_v34 = vpop.f32.mrf.mxu2 }
 0x5d7   :  { %v1393_v8 = vpop.f32.mrf.mxu3 }
 0x5d8   :  { %v1394_v29 = vadd.f32 %v1393_v8, %v1304_v10 }
 0x5d9   :  { %v2608_v14 = vpop.f32.mrf.mxu0 }
 0x5da   :  { %v1431_v31 = vpack.c.bf16 %v1394_v29, %v1392_v56 }
 0x5dc   :  { %1563 = vmatmul.bf16.gmra.mxu0 %v1431_v31  ;;  %v1324_v37 = vpop.f32.mrf.mxu2  ;;  %v1525_v31 = vadd.f32 %v2617_v57, %v2608_v14 }
 0x5df   :  { %v1396_v20 = vpop.f32.mrf.mxu3 }
 0x5e0   :  { %v1397_v24 = vadd.f32 %v1396_v20, %v1307_v53 }
 0x5e1   :  { %v2610_v19 = vpop.f32.mrf.mxu0 }
 0x5e2   :  { %v1527_v29 = vadd.f32 %v2617_v57, %v2610_v19  ;;  %v1515_v19 = vadd.f32 %v2617_v57, %v2600_v4 }
 0x5e4   :  { %v1327_v23 = vpop.f32.mrf.mxu2 }
 0x5e7   :  { %v1398_v43 = vpop.f32.mrf.mxu3 }
 0x5e8   :  { %v1399_v49 = vadd.f32 %v1398_v43, %v1309_v35  ;;  %v1520_v43 = vadd.f32 %v2617_v57, %v2604_v41 }
 0x5e9   :  { %v2612_v58 = vpop.f32.mrf.mxu0 }
 0x5ea   :  { %v1432_v22 = vpack.c.bf16 %v1399_v49, %v1397_v24  ;;  %v1530_v56 = vadd.f32 %v2617_v57, %v2612_v58  ;;  %v1517_v24 = vadd.f32 %v2617_v57, %v2602_v16 }
 0x5ec   :  { %1568 = vmatmul.bf16.gmra.mxu0 %v1432_v22  ;;  %v1329_v38 = vpop.f32.mrf.mxu2 }
 0x5ef   :  { %v1401_v6 = vpop.f32.mrf.mxu3 }
 0x5f0   :  { %v1402_v2 = vadd.f32 %v1401_v6, %v1312_v17  ;;  %v1522_v17 = vadd.f32 %v2617_v57, %v2606_v21 }
 0x5f1   :  { %v1531_v50 = vpop.f32.mrf.mxu0 }
 0x5f2   :  { %v1532_v35 = vadd.f32 %v2617_v57, %v1531_v50 }
 0x5f7   :  { %v1403_v33 = vpop.f32.mrf.mxu3 }
 0x5f8   :  { %v1404_v40 = vadd.f32 %v1403_v33, %v1314_v59 }
 0x5f9   :  { %v1534_v1 = vpop.f32.mrf.mxu0 }
 0x5fa   :  { %v1433_v39 = vpack.c.bf16 %v1404_v40, %v1402_v2  ;;  %v1535_v63 = vadd.f32 %v2617_v57, %v1534_v1  ;;  %v1594_v1 = vld [vmem:[#allocation11] sm:$0xff] }
 0x5fc   :  { %1573 = vmatmul.bf16.gmra.mxu0 %v1433_v39 }
 0x5ff   :  { %v1406_v15 = vpop.f32.mrf.mxu3 }
 0x600   :  { %v1407_v13 = vadd.f32 %v1406_v15, %v1317_v46 }
 0x601   :  { %v1536_v26 = vpop.f32.mrf.mxu0 }
 0x602   :  { %v1537_v53 = vadd.f32 %v2617_v57, %v1536_v26 }
 0x607   :  { %v1408_v45 = vpop.f32.mrf.mxu3 }
 0x608   :  { %v1409_v18 = vadd.f32 %v1408_v45, %v1319_v52 }
 0x609   :  { %v1539_v27 = vpop.f32.mrf.mxu0 }
 0x60a   :  { %v1434_v61 = vpack.c.bf16 %v1409_v18, %v1407_v13  ;;  %v1540_v42 = vadd.f32 %v2617_v57, %v1539_v27 }
 0x60c   :  { %1578 = vmatmul.bf16.gmra.mxu0 %v1434_v61 }
 0x60f   :  { %v1411_v47 = vpop.f32.mrf.mxu3 }
 0x610   :  { %v1412_v11 = vadd.f32 %v1411_v47, %v1322_v34 }
 0x611   :  { %v1541_v30 = vpop.f32.mrf.mxu0 }
 0x612   :  { %v1542_v12 = vadd.f32 %v2617_v57, %v1541_v30 }
 0x617   :  { %v1413_v5 = vpop.f32.mrf.mxu3 }
 0x618   :  { %v1414_v62 = vadd.f32 %v1413_v5, %v1324_v37 }
 0x619   :  { %v1544_v9 = vpop.f32.mrf.mxu0 }
 0x61a   :  { %v1435_v7 = vpack.c.bf16 %v1414_v62, %v1412_v11  ;;  %v1545_v55 = vadd.f32 %v2617_v57, %v1544_v9  ;;  %v1595_v11 = vld [vmem:[#allocation11 + $0x8] sm:$0xff] }
 0x61c   :  { %1583 = vmatmul.bf16.gmra.mxu0 %v1435_v7 }
 0x61f   :  { %v1416_v32 = vpop.f32.mrf.mxu3 }
 0x620   :  { %v1417_v44 = vadd.f32 %v1416_v32, %v1327_v23 }
 0x621   :  { %v1546_v48 = vpop.f32.mrf.mxu0 }
 0x622   :  { %v1547_v10 = vadd.f32 %v2617_v57, %v1546_v48 }
 0x627   :  { %v1418_v54 = vpop.f32.mrf.mxu3 }
 0x628   :  { %v1419_v28 = vadd.f32 %v1418_v54, %v1329_v38 }
 0x629   :  { %v1549_v60 = vpop.f32.mrf.mxu0 }
 0x62a   :  { %v1436_v51 = vpack.c.bf16 %v1419_v28, %v1417_v44  ;;  %v1550_v3 = vadd.f32 %v2617_v57, %v1549_v60 }
 0x62c   :  { %1588 = vmatmul.bf16.gmra.mxu0 %v1436_v51 }
 0x631   :  { %v1551_v0 = vpop.f32.mrf.mxu0 }
 0x632   :  { %v1552_v36 = vadd.f32 %v2617_v57, %v1551_v0 }
 0x634   :  { %1596 = vmatpush.msrb.mxu1 %v1552_v36 }
 0x636   :  { %1597 = vmatpush.msrb.mxu1 %v1550_v3 }
 0x638   :  { %1598 = vmatpush.msrb.mxu1 %v1547_v10 }
 0x639   :  { %v2623_v25 = vpop.f32.mrf.mxu0 }
 0x63a   :  { %1599 = vmatpush.msrb.mxu1 %v1545_v55  ;;  %v1555_v5 = vadd.f32 %v2617_v57, %v2623_v25 }
 0x63c   :  { %1600 = vmatpush.msrb.mxu1 %v1542_v12 }
 0x63e   :  { %1601 = vmatpush.msrb.mxu1 %v1540_v42 }
 0x640   :  { %1602 = vmatpush.msrb.mxu1 %v1537_v53 }
 0x641   :  { %v1556_v8 = vpop.f32.mrf.mxu0 }
 0x642   :  { %1603 = vmatpush.msrb.mxu1 %v1535_v63  ;;  %v1557_v37 = vadd.f32 %v2617_v57, %v1556_v8 }
 0x644   :  { %1604 = vmatpush.msrb.mxu1 %v1532_v35 }
 0x646   :  { %1605 = vmatpush.msrb.mxu1 %v1530_v56 }
 0x648   :  { %1606 = vmatpush.msrb.mxu1 %v1527_v29 }
 0x649   :  { %v1559_v20 = vpop.f32.mrf.mxu0 }
 0x64a   :  { %1607 = vmatpush.msrb.mxu1 %v1525_v31  ;;  %v1560_v30 = vadd.f32 %v2617_v57, %v1559_v20 }
 0x64c   :  { %1608 = vmatpush.msrb.mxu1 %v1522_v17 }
 0x64e   :  { %1609 = vmatpush.msrb.mxu1 %v1520_v43 }
 0x650   :  { %1610 = vmatpush.msrb.mxu1 %v1517_v24 }
 0x651   :  { %v1561_v49 = vpop.f32.mrf.mxu0 }
 0x652   :  { %1611 = vmatpush.msrb.mxu1 %v1515_v19  ;;  %v1562_v47 = vadd.f32 %v2617_v57, %v1561_v49 }
 0x653   :  { %1612 = vmatmul.f32.vlgmr.msrb.gmra.mxu1 %v1594_v1 }
 0x659   :  { %v1564_v14 = vpop.f32.mrf.mxu0 }
 0x65a   :  { %v1565_v61 = vadd.f32 %v2617_v57, %v1564_v14 }
 0x661   :  { %v1566_v58 = vpop.f32.mrf.mxu0 }
 0x662   :  { %v1567_v27 = vadd.f32 %v2617_v57, %v1566_v58 }
 0x669   :  { %v1569_v22 = vpop.f32.mrf.mxu0 }
 0x66a   :  { %v1570_v34 = vadd.f32 %v2617_v57, %v1569_v22 }
 0x671   :  { %v1571_v59 = vpop.f32.mrf.mxu0 }
 0x672   :  { %v1572_v18 = vadd.f32 %v2617_v57, %v1571_v59 }
 0x679   :  { %v1574_v21 = vpop.f32.mrf.mxu0 }
 0x67a   :  { %v1575_v13 = vadd.f32 %v2617_v57, %v1574_v21 }
 0x681   :  { %v1576_v6 = vpop.f32.mrf.mxu0 }
 0x682   :  { %v1577_v45 = vadd.f32 %v2617_v57, %v1576_v6 }
 0x689   :  { %v1579_v50 = vpop.f32.mrf.mxu0 }
 0x68a   :  { %v1580_v26 = vadd.f32 %v2617_v57, %v1579_v50 }
 0x691   :  { %v1581_v46 = vpop.f32.mrf.mxu0 }
 0x692   :  { %v1582_v15 = vadd.f32 %v2617_v57, %v1581_v46 }
 0x699   :  { %v1584_v41 = vpop.f32.mrf.mxu0 }
 0x69a   :  { %v1585_v52 = vadd.f32 %v2617_v57, %v1584_v41 }
 0x6a1   :  { %v1586_v33 = vpop.f32.mrf.mxu0 }
 0x6a2   :  { %v1587_v39 = vadd.f32 %v2617_v57, %v1586_v33 }
 0x6a9   :  { %v1589_v2 = vpop.f32.mrf.mxu0 }
 0x6aa   :  { %v1590_v4 = vadd.f32 %v2617_v57, %v1589_v2 }
 0x6b1   :  { %v1591_v40 = vpop.f32.mrf.mxu0 }
 0x6b2   :  { %v1592_v16 = vadd.f32 %v2617_v57, %v1591_v40 }
 0x6b4   :  { %1616 = vmatpush.msrb.mxu2 %v1592_v16 }
 0x6b6   :  { %1617 = vmatpush.msrb.mxu2 %v1590_v4 }
 0x6b8   :  { %1618 = vmatpush.msrb.mxu2 %v1587_v39 }
 0x6ba   :  { %1619 = vmatpush.msrb.mxu2 %v1585_v52 }
 0x6bc   :  { %1620 = vmatpush.msrb.mxu2 %v1582_v15 }
 0x6be   :  { %1621 = vmatpush.msrb.mxu2 %v1580_v26 }
 0x6c0   :  { %1622 = vmatpush.msrb.mxu2 %v1577_v45 }
 0x6c2   :  { %1623 = vmatpush.msrb.mxu2 %v1575_v13 }
 0x6c4   :  { %1624 = vmatpush.msrb.mxu2 %v1572_v18 }
 0x6c6   :  { %1625 = vmatpush.msrb.mxu2 %v1570_v34 }
 0x6c8   :  { %1626 = vmatpush.msrb.mxu2 %v1567_v27 }
 0x6ca   :  { %1627 = vmatpush.msrb.mxu2 %v1565_v61 }
 0x6cc   :  { %1628 = vmatpush.msrb.mxu2 %v1562_v47 }
 0x6ce   :  { %1629 = vmatpush.msrb.mxu2 %v1560_v30 }
 0x6d0   :  { %1630 = vmatpush.msrb.mxu2 %v1557_v37  ;;  %v1613_v62 = vpop.f32.mrf.mxu1 }
 0x6d2   :  { %1631 = vmatpush.msrb.mxu2 %v1555_v5 }
 0x6d3   :  { %1632 = vmatmul.f32.vlgmr.msrb.gmra.mxu2 %v1595_v11 }
 0x756   :  { %v1633_v9 = vpop.f32.mrf.mxu2 }
 0x757   :  { %v1634_v7 = vadd.f32 %v1633_v9, %v1613_v62 }
 0x759   :  { %1636 = vst [vmem:[#allocation13] sm:$0xff] %v1634_v7 }
 0x75a   :  { %1647 = dma.vmem_to_hbm [thread:$0]  %s1643_s20, 128, %s1645_s22, [#allocation4]  }
 0x75b   :  { %2231 = dma.done.wait [#allocation4], 128  }
 0x75c   :  { %2232 = vsyncadd [#allocation4], 4294967168 }
 0x75d   :  { %1652 = vsyncpa [#allocation3], 1 }
 0x75e   :  { %1653 = vsyncpa [#allocation6], 1 }
 0x75f   :  { %1654 = vsyncpa [#allocation9], 1 }
 0x760   :  { %1655 = vsyncpa [#allocation12], 1 }
 0x761   :  { %1656 = vsyncpa [#allocation4], 1 }

</bundles_post_ra>
